<compile_context>
chip_gen: v7x
topology: tpu7x:2x2x1
jax: 0.10.0
libtpu: 0.0.40
codegen_flags: <defaults>
</compile_context>

<pallas_src>
import functools

import jax
import jax.numpy as jnp
import numpy as np
from jax.experimental import pallas as pl
from jax.experimental.pallas import tpu as pltpu


# ----------------------------------------------------------------------------
# Fused kernel: GRU1 -> ReLU -> BN1(folded) -> GRU2 -> BN2+FC(folded)
# PyTorch GRU cell (gate order r, z, n):
#   r = sigmoid(W_ir x + b_ir + W_hr h + b_hr)
#   z = sigmoid(W_iz x + b_iz + W_hz h + b_hz)
#   n = tanh  (W_in x + b_in + r * (W_hn h + b_hn))
#   h = (1 - z) * n + z * h
# ----------------------------------------------------------------------------
def _gru1_fused_kernel(x_ref, w1_ref, u1_ref, b1_ref, w2_ref, u2_ref, b2_ref,
                       fc_ref, out_ref, gi_ref, *, T, H1, H2):
    TB = x_ref.shape[0]
    B = TB // T

    # ---- loop-invariant loads ------------------------------------------------
    u1 = u1_ref[...]                       # (H1, 3*H1)  recurrent weights r|z|n
    bh1 = b1_ref[1:2, :]                   # (1, 3*H1)   recurrent bias
    w2 = w2_ref[...]                       # (H1, 3*H2)  BN1 scale folded in
    bi2 = b2_ref[0:1, :]                   # (1, 3*H2)   BN1 shift folded in
    bh2 = b2_ref[1:2, :]                   # (1, 3*H2)
    u2_rows = [u2_ref[j:j + 1, :] for j in range(H2)]   # H2 x (1, 3*H2)
    fc = fc_ref[...]                       # (1, H2+1)   BN2 folded into FC
    fw = [fc[:, j:j + 1] for j in range(H2)]            # H2 x (1, 1)
    fcb = fc[:, H2:H2 + 1]                 # (1, 1)

    # ---- hoisted layer-1 input projection (off the recurrent chain) ----------
    # One big (T*B, D) x (D, 3*H1) matmul instead of T tiny per-step matmuls.
    gi_ref[...] = (jnp.dot(x_ref[...], w1_ref[...],
                           preferred_element_type=jnp.float32)
                   + b1_ref[0:1, :])

    def sigm(v):                           # sigmoid via a single EUP tanh
        return 0.5 * jnp.tanh(0.5 * v) + 0.5

    h1 = jnp.zeros((B, H1), jnp.float32)
    h2 = jnp.zeros((B, H2), jnp.float32)
    ys = []

    # Statically unrolled time loop (T small); recurrent states stay in vregs.
    for t in range(T):
        # ---- GRU layer 1: only the recurrent matmul is on the serial chain ---
        gi = gi_ref[t * B:(t + 1) * B, :]                                # (B, 3H1)
        gh = jnp.dot(h1, u1, preferred_element_type=jnp.float32) + bh1   # (B, 3H1)
        rz = sigm(gi[:, :2 * H1] + gh[:, :2 * H1])
        r, z = rz[:, :H1], rz[:, H1:]
        n = jnp.tanh(gi[:, 2 * H1:] + r * gh[:, 2 * H1:])
        h1 = (1.0 - z) * n + z * h1

        # dropout1 = identity (eval); ReLU; BN1 folded into w2/bi2.
        x2 = jnp.maximum(h1, 0.0)

        # ---- GRU layer 2: input projection on MXU, recurrent part on VPU -----
        gi2 = jnp.dot(x2, w2, preferred_element_type=jnp.float32) + bi2   # (B, 3H2)
        gh2 = bh2
        for j in range(H2):               # H2 == 2: two broadcast-muls + adds
            gh2 = gh2 + h2[:, j:j + 1] * u2_rows[j]                       # (B, 3H2)
        rz2 = sigm(gi2[:, :2 * H2] + gh2[:, :2 * H2])
        r2, z2 = rz2[:, :H2], rz2[:, H2:]
        n2 = jnp.tanh(gi2[:, 2 * H2:] + r2 * gh2[:, 2 * H2:])
        h2 = (1.0 - z2) * n2 + z2 * h2

        # dropout2 = identity; BN2 + fc1 folded into fc: VPU only, no XLU reduce.
        y = fcb
        for j in range(H2):
            y = y + h2[:, j:j + 1] * fw[j]                                # (B, 1)
        ys.append(y)

    out_ref[...] = jnp.concatenate(ys, axis=1)                            # (B, T)


# ----------------------------------------------------------------------------
# One-time parameter packing (outside the forward pass)
# ----------------------------------------------------------------------------
def prepare_params(p, eps=1e-5):
    """Fold BN(eval) into adjacent matmuls and concatenate GRU gate weights."""
    s1 = p['bn1_gamma'] / jnp.sqrt(p['bn1_var'] + eps)
    sh1 = p['bn1_beta'] - p['bn1_mean'] * s1
    s2 = p['bn2_gamma'] / jnp.sqrt(p['bn2_var'] + eps)
    sh2 = p['bn2_beta'] - p['bn2_mean'] * s2

    # GRU 1: (3H1, D)/(3H1, H1) -> transposed, gates stay concatenated r|z|n.
    w1 = p['w_ih1'].T                                      # (D, 3H1)
    u1 = p['w_hh1'].T                                      # (H1, 3H1)
    b1 = jnp.stack([p['b_ih1'], p['b_hh1']])               # (2, 3H1)

    # GRU 2 with BN1 folded into the input transform:
    #   gi2 = (relu(h1)*s1 + sh1) @ Wih2^T + b_ih2
    #       = relu(h1) @ (s1[:,None]*Wih2^T) + (sh1 @ Wih2^T + b_ih2)
    w2 = s1[:, None] * p['w_ih2'].T                        # (H1, 3H2)
    u2 = p['w_hh2'].T                                      # (H2, 3H2)
    bi2 = sh1 @ p['w_ih2'].T + p['b_ih2']                  # (3H2,)
    b2 = jnp.stack([bi2, p['b_hh2']])                      # (2, 3H2)

    # BN2 + Linear(H2 -> 1):
    #   y = (h2*s2 + sh2) @ fc_w^T + fc_b = h2 @ (fc_w*s2)^T + (sh2·fc_w + fc_b)
    fcw = p['fc_w'] * s2                                   # (1, H2)
    fcb = (sh2 @ p['fc_w'][0] + p['fc_b'][0]).reshape(1, 1)
    fc = jnp.concatenate([fcw, fcb], axis=1)               # (1, H2+1)

    return dict(w1=w1, u1=u1, b1=b1, w2=w2, u2=u2, b2=b2, fc=fc)


# ----------------------------------------------------------------------------
# Forward
# ----------------------------------------------------------------------------
@jax.jit
def gru1_forward(x, pp):
    """x: (B, T, D) float32 (PyTorch batch-first). Returns (B, T, 1)."""
    B, T, D = x.shape
    H1 = pp['u1'].shape[0]
    H2 = pp['u2'].shape[0]

    # Time-major, flattened to (T*B, D) so the layer-1 input projection is a
    # single matmul inside the kernel.
    xt = jnp.transpose(x, (1, 0, 2)).reshape(T * B, D).astype(jnp.float32)

    kernel = functools.partial(_gru1_fused_kernel, T=T, H1=H1, H2=H2)
    vmem = lambda: pl.BlockSpec(memory_space=pltpu.MemorySpace.VMEM)

    out = pl.pallas_call(
        kernel,
        out_shape=jax.ShapeDtypeStruct((B, T), jnp.float32),
        in_specs=[vmem() for _ in range(8)],
        out_specs=vmem(),
        scratch_shapes=[pltpu.VMEM((T * B, 3 * H1), jnp.float32)],
    )(xt, pp['w1'], pp['u1'], pp['b1'], pp['w2'], pp['u2'], pp['b2'], pp['fc'])

    return out[..., None]                                   # (B, T, 1)


# ----------------------------------------------------------------------------
# Pure-JAX reference (for a correctness check)
# ----------------------------------------------------------------------------
def _gru_ref(x_tbd, w_ih, w_hh, b_ih, b_hh):
    H = w_ih.shape[0] // 3

    def cell(h, x_t):
        gi = x_t @ w_ih.T + b_ih
        gh = h @ w_hh.T + b_hh
        r = jax.nn.sigmoid(gi[:, :H] + gh[:, :H])
        z = jax.nn.sigmoid(gi[:, H:2 * H] + gh[:, H:2 * H])
        n = jnp.tanh(gi[:, 2 * H:] + r * gh[:, 2 * H:])
        h_new = (1.0 - z) * n + z * h
        return h_new, h_new

    h0 = jnp.zeros((x_tbd.shape[1], H), jnp.float32)
    _, out = jax.lax.scan(cell, h0, x_tbd)
    return out


def ref_forward(x, p, eps=1e-5):
    xt = jnp.transpose(x, (1, 0, 2)).astype(jnp.float32)
    s1 = p['bn1_gamma'] / jnp.sqrt(p['bn1_var'] + eps)
    sh1 = p['bn1_beta'] - p['bn1_mean'] * s1
    s2 = p['bn2_gamma'] / jnp.sqrt(p['bn2_var'] + eps)
    sh2 = p['bn2_beta'] - p['bn2_mean'] * s2
    o1 = _gru_ref(xt, p['w_ih1'], p['w_hh1'], p['b_ih1'], p['b_hh1'])
    o1 = jnp.maximum(o1, 0.0) * s1 + sh1
    o2 = _gru_ref(o1, p['w_ih2'], p['w_hh2'], p['b_ih2'], p['b_hh2'])
    o2 = o2 * s2 + sh2
    out = o2 @ p['fc_w'].T + p['fc_b']
    return jnp.transpose(out, (1, 0, 2))


# ----------------------------------------------------------------------------
if __name__ == "__main__":
    B, T = 2, 8
    D, H1, H2, OUT = 54, 32, 2, 1

    key = jax.random.PRNGKey(0)
    keys = jax.random.split(key, 18)

    def u(k, shape, bound):
        return jax.random.uniform(k, shape, jnp.float32, -bound, bound)

    s1 = 1.0 / float(np.sqrt(H1))
    s2 = 1.0 / float(np.sqrt(H2))

    params = dict(
        # nn.GRU(54, 32): weight_ih_l0 (3H1, D), weight_hh_l0 (3H1, H1)
        w_ih1=u(keys[0], (3 * H1, D), s1), w_hh1=u(keys[1], (3 * H1, H1), s1),
        b_ih1=u(keys[2], (3 * H1,), s1), b_hh1=u(keys[3], (3 * H1,), s1),
        # nn.GRU(32, 2)
        w_ih2=u(keys[4], (3 * H2, H1), s2), w_hh2=u(keys[5], (3 * H2, H2), s2),
        b_ih2=u(keys[6], (3 * H2,), s2), b_hh2=u(keys[7], (3 * H2,), s2),
        # BatchNorm1d(32) — eval-mode params / running stats
        bn1_gamma=1.0 + 0.1 * jax.random.normal(keys[8], (H1,), jnp.float32),
        bn1_beta=0.1 * jax.random.normal(keys[9], (H1,), jnp.float32),
        bn1_mean=0.1 * jax.random.normal(keys[10], (H1,), jnp.float32),
        bn1_var=jnp.abs(1.0 + 0.1 * jax.random.normal(keys[11], (H1,), jnp.float32)),
        # BatchNorm1d(2)
        bn2_gamma=1.0 + 0.1 * jax.random.normal(keys[12], (H2,), jnp.float32),
        bn2_beta=0.1 * jax.random.normal(keys[13], (H2,), jnp.float32),
        bn2_mean=0.1 * jax.random.normal(keys[14], (H2,), jnp.float32),
        bn2_var=jnp.abs(1.0 + 0.1 * jax.random.normal(keys[15], (H2,), jnp.float32)),
        # nn.Linear(2, 1)
        fc_w=u(keys[16], (OUT, H2), s2), fc_b=u(keys[17], (OUT,), s2),
    )

    x = jax.random.normal(jax.random.PRNGKey(1), (B, T, D), jnp.float32)

    packed = prepare_params(params)                 # one-time weight packing / BN folding
    out = jax.block_until_ready(gru1_forward(x, packed))
    assert out.shape == (B, T, OUT)

    ref = jax.block_until_ready(ref_forward(x, params))
    np.testing.assert_allclose(np.asarray(out), np.asarray(ref), rtol=2e-3, atol=2e-3)

    # TODO(synk): dropout is identity (eval mode); training-mode dropout / batch-stat BN not implemented.
    print("KERNEL_OK")
</pallas_src>

<mosaic_0001>
module attributes {stable_mosaic.version = 11 : i64} {
  func.func @_gru1_fused_kernel(%arg0: memref<16x54xf32, #tpu.memory_space<vmem>>, %arg1: memref<54x96xf32, #tpu.memory_space<vmem>>, %arg2: memref<32x96xf32, #tpu.memory_space<vmem>>, %arg3: memref<2x96xf32, #tpu.memory_space<vmem>>, %arg4: memref<32x6xf32, #tpu.memory_space<vmem>>, %arg5: memref<2x6xf32, #tpu.memory_space<vmem>>, %arg6: memref<2x6xf32, #tpu.memory_space<vmem>>, %arg7: memref<1x3xf32, #tpu.memory_space<vmem>>, %arg8: memref<2x8xf32, #tpu.memory_space<vmem>>, %arg9: memref<16x96xf32, #tpu.memory_space<vmem>>) attributes {dimension_semantics = [], scalar_prefetch = 0 : i64, scratch_operands = 1 : i64, tpu.core_type = #tpu.core_type<tc>} {
    %c0 = arith.constant 0 : index
    %c0_0 = arith.constant 0 : index
    %0 = vector.load %arg2[%c0, %c0_0] : memref<32x96xf32, #tpu.memory_space<vmem>>, vector<32x96xf32>
    %c1 = arith.constant 1 : index
    %c0_1 = arith.constant 0 : index
    %1 = vector.load %arg3[%c1, %c0_1] : memref<2x96xf32, #tpu.memory_space<vmem>>, vector<1x96xf32>
    %c0_2 = arith.constant 0 : index
    %c0_3 = arith.constant 0 : index
    %2 = vector.load %arg4[%c0_2, %c0_3] : memref<32x6xf32, #tpu.memory_space<vmem>>, vector<32x6xf32>
    %c0_4 = arith.constant 0 : index
    %c0_5 = arith.constant 0 : index
    %3 = vector.load %arg6[%c0_4, %c0_5] : memref<2x6xf32, #tpu.memory_space<vmem>>, vector<1x6xf32>
    %c1_6 = arith.constant 1 : index
    %c0_7 = arith.constant 0 : index
    %4 = vector.load %arg6[%c1_6, %c0_7] : memref<2x6xf32, #tpu.memory_space<vmem>>, vector<1x6xf32>
    %c0_8 = arith.constant 0 : index
    %c0_9 = arith.constant 0 : index
    %5 = vector.load %arg5[%c0_8, %c0_9] : memref<2x6xf32, #tpu.memory_space<vmem>>, vector<1x6xf32>
    %c1_10 = arith.constant 1 : index
    %c0_11 = arith.constant 0 : index
    %6 = vector.load %arg5[%c1_10, %c0_11] : memref<2x6xf32, #tpu.memory_space<vmem>>, vector<1x6xf32>
    %c0_12 = arith.constant 0 : index
    %c0_13 = arith.constant 0 : index
    %7 = vector.load %arg7[%c0_12, %c0_13] : memref<1x3xf32, #tpu.memory_space<vmem>>, vector<1x3xf32>
    %8 = vector.extract_strided_slice %7 {offsets = [0, 0], sizes = [1, 1], strides = [1, 1]} : vector<1x3xf32> to vector<1x1xf32>
    %9 = vector.extract_strided_slice %7 {offsets = [0, 1], sizes = [1, 1], strides = [1, 1]} : vector<1x3xf32> to vector<1x1xf32>
    %10 = vector.extract_strided_slice %7 {offsets = [0, 2], sizes = [1, 1], strides = [1, 1]} : vector<1x3xf32> to vector<1x1xf32>
    %c0_14 = arith.constant 0 : index
    %c0_15 = arith.constant 0 : index
    %11 = vector.load %arg0[%c0_14, %c0_15] : memref<16x54xf32, #tpu.memory_space<vmem>>, vector<16x54xf32>
    %c0_16 = arith.constant 0 : index
    %c0_17 = arith.constant 0 : index
    %12 = vector.load %arg1[%c0_16, %c0_17] : memref<54x96xf32, #tpu.memory_space<vmem>>, vector<54x96xf32>
    %cst = arith.constant dense<0.000000e+00> : vector<16x96xf32>
    %13 = tpu.matmul %11, %12, %cst {dimension_numbers = #tpu.dot_dimension_numbers<[1], [0], [0], [1], [0, 0, 1, 1], [], []>} : vector<16x54xf32>, vector<54x96xf32>, vector<16x96xf32> -> vector<16x96xf32>
    %c0_18 = arith.constant 0 : index
    %c0_19 = arith.constant 0 : index
    %14 = vector.load %arg3[%c0_18, %c0_19] : memref<2x96xf32, #tpu.memory_space<vmem>>, vector<1x96xf32>
    %15 = vector.broadcast %14 : vector<1x96xf32> to vector<16x96xf32>
    %16 = arith.addf %13, %15 : vector<16x96xf32>
    %c0_20 = arith.constant 0 : index
    %c0_21 = arith.constant 0 : index
    %17 = vector.load %arg9[%c0_20, %c0_21] : memref<16x96xf32, #tpu.memory_space<vmem>>, vector<16x96xf32>
    tpu.vector_store %arg9[%c0_20, %c0_21], %16 {strides = array<i32>} : memref<16x96xf32, #tpu.memory_space<vmem>>, vector<16x96xf32>,
    %cst_22 = arith.constant 0.000000e+00 : f32
    %18 = vector.broadcast %cst_22 : f32 to vector<2x32xf32>
    %cst_23 = arith.constant 0.000000e+00 : f32
    %19 = vector.broadcast %cst_23 : f32 to vector<2x2xf32>
    %c0_24 = arith.constant 0 : index
    %c0_25 = arith.constant 0 : index
    %20 = vector.load %arg9[%c0_24, %c0_25] : memref<16x96xf32, #tpu.memory_space<vmem>>, vector<2x96xf32>
    %cst_26 = arith.constant dense<0.000000e+00> : vector<2x96xf32>
    %21 = tpu.matmul %18, %0, %cst_26 {dimension_numbers = #tpu.dot_dimension_numbers<[1], [0], [0], [1], [0, 0, 1, 1], [], []>} : vector<2x32xf32>, vector<32x96xf32>, vector<2x96xf32> -> vector<2x96xf32>
    %22 = vector.broadcast %1 : vector<1x96xf32> to vector<2x96xf32>
    %23 = arith.addf %21, %22 : vector<2x96xf32>
    %24 = vector.extract_strided_slice %20 {offsets = [0, 0], sizes = [2, 64], strides = [1, 1]} : vector<2x96xf32> to vector<2x64xf32>
    %25 = vector.extract_strided_slice %23 {offsets = [0, 0], sizes = [2, 64], strides = [1, 1]} : vector<2x96xf32> to vector<2x64xf32>
    %26 = arith.addf %24, %25 : vector<2x64xf32>
    %cst_27 = arith.constant 5.000000e-01 : f32
    %27 = vector.broadcast %cst_27 : f32 to vector<2x64xf32>
    %28 = arith.mulf %27, %26 : vector<2x64xf32>
    %29 = math.tanh %28 : vector<2x64xf32>
    %cst_28 = arith.constant 5.000000e-01 : f32
    %30 = vector.broadcast %cst_28 : f32 to vector<2x64xf32>
    %31 = arith.mulf %30, %29 : vector<2x64xf32>
    %cst_29 = arith.constant 5.000000e-01 : f32
    %32 = vector.broadcast %cst_29 : f32 to vector<2x64xf32>
    %33 = arith.addf %31, %32 : vector<2x64xf32>
    %34 = vector.extract_strided_slice %33 {offsets = [0, 0], sizes = [2, 32], strides = [1, 1]} : vector<2x64xf32> to vector<2x32xf32>
    %35 = vector.extract_strided_slice %33 {offsets = [0, 32], sizes = [2, 32], strides = [1, 1]} : vector<2x64xf32> to vector<2x32xf32>
    %36 = vector.extract_strided_slice %20 {offsets = [0, 64], sizes = [2, 32], strides = [1, 1]} : vector<2x96xf32> to vector<2x32xf32>
    %37 = vector.extract_strided_slice %23 {offsets = [0, 64], sizes = [2, 32], strides = [1, 1]} : vector<2x96xf32> to vector<2x32xf32>
    %38 = arith.mulf %34, %37 : vector<2x32xf32>
    %39 = arith.addf %36, %38 : vector<2x32xf32>
    %40 = math.tanh %39 : vector<2x32xf32>
    %cst_30 = arith.constant 1.000000e+00 : f32
    %41 = vector.broadcast %cst_30 : f32 to vector<2x32xf32>
    %42 = arith.subf %41, %35 : vector<2x32xf32>
    %43 = arith.mulf %42, %40 : vector<2x32xf32>
    %44 = arith.mulf %35, %18 : vector<2x32xf32>
    %45 = arith.addf %43, %44 : vector<2x32xf32>
    %cst_31 = arith.constant 0.000000e+00 : f32
    %46 = vector.broadcast %cst_31 : f32 to vector<2x32xf32>
    %47 = arith.maximumf %45, %46 : vector<2x32xf32>
    %cst_32 = arith.constant dense<0.000000e+00> : vector<2x6xf32>
    %48 = tpu.matmul %47, %2, %cst_32 {dimension_numbers = #tpu.dot_dimension_numbers<[1], [0], [0], [1], [0, 0, 1, 1], [], []>} : vector<2x32xf32>, vector<32x6xf32>, vector<2x6xf32> -> vector<2x6xf32>
    %49 = vector.broadcast %3 : vector<1x6xf32> to vector<2x6xf32>
    %50 = arith.addf %48, %49 : vector<2x6xf32>
    %51 = vector.extract_strided_slice %19 {offsets = [0, 0], sizes = [2, 1], strides = [1, 1]} : vector<2x2xf32> to vector<2x1xf32>
    %52 = vector.broadcast %51 : vector<2x1xf32> to vector<2x6xf32>
    %53 = vector.broadcast %5 : vector<1x6xf32> to vector<2x6xf32>
    %54 = arith.mulf %52, %53 : vector<2x6xf32>
    %55 = vector.broadcast %4 : vector<1x6xf32> to vector<2x6xf32>
    %56 = arith.addf %55, %54 : vector<2x6xf32>
    %57 = vector.extract_strided_slice %19 {offsets = [0, 1], sizes = [2, 1], strides = [1, 1]} : vector<2x2xf32> to vector<2x1xf32>
    %58 = vector.broadcast %57 : vector<2x1xf32> to vector<2x6xf32>
    %59 = vector.broadcast %6 : vector<1x6xf32> to vector<2x6xf32>
    %60 = arith.mulf %58, %59 : vector<2x6xf32>
    %61 = arith.addf %56, %60 : vector<2x6xf32>
    %62 = vector.extract_strided_slice %50 {offsets = [0, 0], sizes = [2, 4], strides = [1, 1]} : vector<2x6xf32> to vector<2x4xf32>
    %63 = vector.extract_strided_slice %61 {offsets = [0, 0], sizes = [2, 4], strides = [1, 1]} : vector<2x6xf32> to vector<2x4xf32>
    %64 = arith.addf %62, %63 : vector<2x4xf32>
    %cst_33 = arith.constant 5.000000e-01 : f32
    %65 = vector.broadcast %cst_33 : f32 to vector<2x4xf32>
    %66 = arith.mulf %65, %64 : vector<2x4xf32>
    %67 = math.tanh %66 : vector<2x4xf32>
    %cst_34 = arith.constant 5.000000e-01 : f32
    %68 = vector.broadcast %cst_34 : f32 to vector<2x4xf32>
    %69 = arith.mulf %68, %67 : vector<2x4xf32>
    %cst_35 = arith.constant 5.000000e-01 : f32
    %70 = vector.broadcast %cst_35 : f32 to vector<2x4xf32>
    %71 = arith.addf %69, %70 : vector<2x4xf32>
    %72 = vector.extract_strided_slice %71 {offsets = [0, 0], sizes = [2, 2], strides = [1, 1]} : vector<2x4xf32> to vector<2x2xf32>
    %73 = vector.extract_strided_slice %71 {offsets = [0, 2], sizes = [2, 2], strides = [1, 1]} : vector<2x4xf32> to vector<2x2xf32>
    %74 = vector.extract_strided_slice %50 {offsets = [0, 4], sizes = [2, 2], strides = [1, 1]} : vector<2x6xf32> to vector<2x2xf32>
    %75 = vector.extract_strided_slice %61 {offsets = [0, 4], sizes = [2, 2], strides = [1, 1]} : vector<2x6xf32> to vector<2x2xf32>
    %76 = arith.mulf %72, %75 : vector<2x2xf32>
    %77 = arith.addf %74, %76 : vector<2x2xf32>
    %78 = math.tanh %77 : vector<2x2xf32>
    %cst_36 = arith.constant 1.000000e+00 : f32
    %79 = vector.broadcast %cst_36 : f32 to vector<2x2xf32>
    %80 = arith.subf %79, %73 : vector<2x2xf32>
    %81 = arith.mulf %80, %78 : vector<2x2xf32>
    %82 = arith.mulf %73, %19 : vector<2x2xf32>
    %83 = arith.addf %81, %82 : vector<2x2xf32>
    %84 = vector.extract_strided_slice %83 {offsets = [0, 0], sizes = [2, 1], strides = [1, 1]} : vector<2x2xf32> to vector<2x1xf32>
    %85 = vector.broadcast %8 : vector<1x1xf32> to vector<2x1xf32>
    %86 = arith.mulf %84, %85 : vector<2x1xf32>
    %87 = vector.broadcast %10 : vector<1x1xf32> to vector<2x1xf32>
    %88 = arith.addf %87, %86 : vector<2x1xf32>
    %89 = vector.extract_strided_slice %83 {offsets = [0, 1], sizes = [2, 1], strides = [1, 1]} : vector<2x2xf32> to vector<2x1xf32>
    %90 = vector.broadcast %9 : vector<1x1xf32> to vector<2x1xf32>
    %91 = arith.mulf %89, %90 : vector<2x1xf32>
    %92 = arith.addf %88, %91 : vector<2x1xf32>
    %c2 = arith.constant 2 : index
    %c0_37 = arith.constant 0 : index
    %93 = vector.load %arg9[%c2, %c0_37] : memref<16x96xf32, #tpu.memory_space<vmem>>, vector<2x96xf32>
    %cst_38 = arith.constant dense<0.000000e+00> : vector<2x96xf32>
    %94 = tpu.matmul %45, %0, %cst_38 {dimension_numbers = #tpu.dot_dimension_numbers<[1], [0], [0], [1], [0, 0, 1, 1], [], []>} : vector<2x32xf32>, vector<32x96xf32>, vector<2x96xf32> -> vector<2x96xf32>
    %95 = vector.broadcast %1 : vector<1x96xf32> to vector<2x96xf32>
    %96 = arith.addf %94, %95 : vector<2x96xf32>
    %97 = vector.extract_strided_slice %93 {offsets = [0, 0], sizes = [2, 64], strides = [1, 1]} : vector<2x96xf32> to vector<2x64xf32>
    %98 = vector.extract_strided_slice %96 {offsets = [0, 0], sizes = [2, 64], strides = [1, 1]} : vector<2x96xf32> to vector<2x64xf32>
    %99 = arith.addf %97, %98 : vector<2x64xf32>
    %cst_39 = arith.constant 5.000000e-01 : f32
    %100 = vector.broadcast %cst_39 : f32 to vector<2x64xf32>
    %101 = arith.mulf %100, %99 : vector<2x64xf32>
    %102 = math.tanh %101 : vector<2x64xf32>
    %cst_40 = arith.constant 5.000000e-01 : f32
    %103 = vector.broadcast %cst_40 : f32 to vector<2x64xf32>
    %104 = arith.mulf %103, %102 : vector<2x64xf32>
    %cst_41 = arith.constant 5.000000e-01 : f32
    %105 = vector.broadcast %cst_41 : f32 to vector<2x64xf32>
    %106 = arith.addf %104, %105 : vector<2x64xf32>
    %107 = vector.extract_strided_slice %106 {offsets = [0, 0], sizes = [2, 32], strides = [1, 1]} : vector<2x64xf32> to vector<2x32xf32>
    %108 = vector.extract_strided_slice %106 {offsets = [0, 32], sizes = [2, 32], strides = [1, 1]} : vector<2x64xf32> to vector<2x32xf32>
    %109 = vector.extract_strided_slice %93 {offsets = [0, 64], sizes = [2, 32], strides = [1, 1]} : vector<2x96xf32> to vector<2x32xf32>
    %110 = vector.extract_strided_slice %96 {offsets = [0, 64], sizes = [2, 32], strides = [1, 1]} : vector<2x96xf32> to vector<2x32xf32>
    %111 = arith.mulf %107, %110 : vector<2x32xf32>
    %112 = arith.addf %109, %111 : vector<2x32xf32>
    %113 = math.tanh %112 : vector<2x32xf32>
    %cst_42 = arith.constant 1.000000e+00 : f32
    %114 = vector.broadcast %cst_42 : f32 to vector<2x32xf32>
    %115 = arith.subf %114, %108 : vector<2x32xf32>
    %116 = arith.mulf %115, %113 : vector<2x32xf32>
    %117 = arith.mulf %108, %45 : vector<2x32xf32>
    %118 = arith.addf %116, %117 : vector<2x32xf32>
    %cst_43 = arith.constant 0.000000e+00 : f32
    %119 = vector.broadcast %cst_43 : f32 to vector<2x32xf32>
    %120 = arith.maximumf %118, %119 : vector<2x32xf32>
    %cst_44 = arith.constant dense<0.000000e+00> : vector<2x6xf32>
    %121 = tpu.matmul %120, %2, %cst_44 {dimension_numbers = #tpu.dot_dimension_numbers<[1], [0], [0], [1], [0, 0, 1, 1], [], []>} : vector<2x32xf32>, vector<32x6xf32>, vector<2x6xf32> -> vector<2x6xf32>
    %122 = vector.broadcast %3 : vector<1x6xf32> to vector<2x6xf32>
    %123 = arith.addf %121, %122 : vector<2x6xf32>
    %124 = vector.extract_strided_slice %83 {offsets = [0, 0], sizes = [2, 1], strides = [1, 1]} : vector<2x2xf32> to vector<2x1xf32>
    %125 = vector.broadcast %124 : vector<2x1xf32> to vector<2x6xf32>
    %126 = vector.broadcast %5 : vector<1x6xf32> to vector<2x6xf32>
    %127 = arith.mulf %125, %126 : vector<2x6xf32>
    %128 = vector.broadcast %4 : vector<1x6xf32> to vector<2x6xf32>
    %129 = arith.addf %128, %127 : vector<2x6xf32>
    %130 = vector.extract_strided_slice %83 {offsets = [0, 1], sizes = [2, 1], strides = [1, 1]} : vector<2x2xf32> to vector<2x1xf32>
    %131 = vector.broadcast %130 : vector<2x1xf32> to vector<2x6xf32>
    %132 = vector.broadcast %6 : vector<1x6xf32> to vector<2x6xf32>
    %133 = arith.mulf %131, %132 : vector<2x6xf32>
    %134 = arith.addf %129, %133 : vector<2x6xf32>
    %135 = vector.extract_strided_slice %123 {offsets = [0, 0], sizes = [2, 4], strides = [1, 1]} : vector<2x6xf32> to vector<2x4xf32>
    %136 = vector.extract_strided_slice %134 {offsets = [0, 0], sizes = [2, 4], strides = [1, 1]} : vector<2x6xf32> to vector<2x4xf32>
    %137 = arith.addf %135, %136 : vector<2x4xf32>
    %cst_45 = arith.constant 5.000000e-01 : f32
    %138 = vector.broadcast %cst_45 : f32 to vector<2x4xf32>
    %139 = arith.mulf %138, %137 : vector<2x4xf32>
    %140 = math.tanh %139 : vector<2x4xf32>
    %cst_46 = arith.constant 5.000000e-01 : f32
    %141 = vector.broadcast %cst_46 : f32 to vector<2x4xf32>
    %142 = arith.mulf %141, %140 : vector<2x4xf32>
    %cst_47 = arith.constant 5.000000e-01 : f32
    %143 = vector.broadcast %cst_47 : f32 to vector<2x4xf32>
    %144 = arith.addf %142, %143 : vector<2x4xf32>
    %145 = vector.extract_strided_slice %144 {offsets = [0, 0], sizes = [2, 2], strides = [1, 1]} : vector<2x4xf32> to vector<2x2xf32>
    %146 = vector.extract_strided_slice %144 {offsets = [0, 2], sizes = [2, 2], strides = [1, 1]} : vector<2x4xf32> to vector<2x2xf32>
    %147 = vector.extract_strided_slice %123 {offsets = [0, 4], sizes = [2, 2], strides = [1, 1]} : vector<2x6xf32> to vector<2x2xf32>
    %148 = vector.extract_strided_slice %134 {offsets = [0, 4], sizes = [2, 2], strides = [1, 1]} : vector<2x6xf32> to vector<2x2xf32>
    %149 = arith.mulf %145, %148 : vector<2x2xf32>
    %150 = arith.addf %147, %149 : vector<2x2xf32>
    %151 = math.tanh %150 : vector<2x2xf32>
    %cst_48 = arith.constant 1.000000e+00 : f32
    %152 = vector.broadcast %cst_48 : f32 to vector<2x2xf32>
    %153 = arith.subf %152, %146 : vector<2x2xf32>
    %154 = arith.mulf %153, %151 : vector<2x2xf32>
    %155 = arith.mulf %146, %83 : vector<2x2xf32>
    %156 = arith.addf %154, %155 : vector<2x2xf32>
    %157 = vector.extract_strided_slice %156 {offsets = [0, 0], sizes = [2, 1], strides = [1, 1]} : vector<2x2xf32> to vector<2x1xf32>
    %158 = vector.broadcast %8 : vector<1x1xf32> to vector<2x1xf32>
    %159 = arith.mulf %157, %158 : vector<2x1xf32>
    %160 = vector.broadcast %10 : vector<1x1xf32> to vector<2x1xf32>
    %161 = arith.addf %160, %159 : vector<2x1xf32>
    %162 = vector.extract_strided_slice %156 {offsets = [0, 1], sizes = [2, 1], strides = [1, 1]} : vector<2x2xf32> to vector<2x1xf32>
    %163 = vector.broadcast %9 : vector<1x1xf32> to vector<2x1xf32>
    %164 = arith.mulf %162, %163 : vector<2x1xf32>
    %165 = arith.addf %161, %164 : vector<2x1xf32>
    %c4 = arith.constant 4 : index
    %c0_49 = arith.constant 0 : index
    %166 = vector.load %arg9[%c4, %c0_49] : memref<16x96xf32, #tpu.memory_space<vmem>>, vector<2x96xf32>
    %cst_50 = arith.constant dense<0.000000e+00> : vector<2x96xf32>
    %167 = tpu.matmul %118, %0, %cst_50 {dimension_numbers = #tpu.dot_dimension_numbers<[1], [0], [0], [1], [0, 0, 1, 1], [], []>} : vector<2x32xf32>, vector<32x96xf32>, vector<2x96xf32> -> vector<2x96xf32>
    %168 = vector.broadcast %1 : vector<1x96xf32> to vector<2x96xf32>
    %169 = arith.addf %167, %168 : vector<2x96xf32>
    %170 = vector.extract_strided_slice %166 {offsets = [0, 0], sizes = [2, 64], strides = [1, 1]} : vector<2x96xf32> to vector<2x64xf32>
    %171 = vector.extract_strided_slice %169 {offsets = [0, 0], sizes = [2, 64], strides = [1, 1]} : vector<2x96xf32> to vector<2x64xf32>
    %172 = arith.addf %170, %171 : vector<2x64xf32>
    %cst_51 = arith.constant 5.000000e-01 : f32
    %173 = vector.broadcast %cst_51 : f32 to vector<2x64xf32>
    %174 = arith.mulf %173, %172 : vector<2x64xf32>
    %175 = math.tanh %174 : vector<2x64xf32>
    %cst_52 = arith.constant 5.000000e-01 : f32
    %176 = vector.broadcast %cst_52 : f32 to vector<2x64xf32>
    %177 = arith.mulf %176, %175 : vector<2x64xf32>
    %cst_53 = arith.constant 5.000000e-01 : f32
    %178 = vector.broadcast %cst_53 : f32 to vector<2x64xf32>
    %179 = arith.addf %177, %178 : vector<2x64xf32>
    %180 = vector.extract_strided_slice %179 {offsets = [0, 0], sizes = [2, 32], strides = [1, 1]} : vector<2x64xf32> to vector<2x32xf32>
    %181 = vector.extract_strided_slice %179 {offsets = [0, 32], sizes = [2, 32], strides = [1, 1]} : vector<2x64xf32> to vector<2x32xf32>
    %182 = vector.extract_strided_slice %166 {offsets = [0, 64], sizes = [2, 32], strides = [1, 1]} : vector<2x96xf32> to vector<2x32xf32>
    %183 = vector.extract_strided_slice %169 {offsets = [0, 64], sizes = [2, 32], strides = [1, 1]} : vector<2x96xf32> to vector<2x32xf32>
    %184 = arith.mulf %180, %183 : vector<2x32xf32>
    %185 = arith.addf %182, %184 : vector<2x32xf32>
    %186 = math.tanh %185 : vector<2x32xf32>
    %cst_54 = arith.constant 1.000000e+00 : f32
    %187 = vector.broadcast %cst_54 : f32 to vector<2x32xf32>
    %188 = arith.subf %187, %181 : vector<2x32xf32>
    %189 = arith.mulf %188, %186 : vector<2x32xf32>
    %190 = arith.mulf %181, %118 : vector<2x32xf32>
    %191 = arith.addf %189, %190 : vector<2x32xf32>
    %cst_55 = arith.constant 0.000000e+00 : f32
    %192 = vector.broadcast %cst_55 : f32 to vector<2x32xf32>
    %193 = arith.maximumf %191, %192 : vector<2x32xf32>
    %cst_56 = arith.constant dense<0.000000e+00> : vector<2x6xf32>
    %194 = tpu.matmul %193, %2, %cst_56 {dimension_numbers = #tpu.dot_dimension_numbers<[1], [0], [0], [1], [0, 0, 1, 1], [], []>} : vector<2x32xf32>, vector<32x6xf32>, vector<2x6xf32> -> vector<2x6xf32>
    %195 = vector.broadcast %3 : vector<1x6xf32> to vector<2x6xf32>
    %196 = arith.addf %194, %195 : vector<2x6xf32>
    %197 = vector.extract_strided_slice %156 {offsets = [0, 0], sizes = [2, 1], strides = [1, 1]} : vector<2x2xf32> to vector<2x1xf32>
    %198 = vector.broadcast %197 : vector<2x1xf32> to vector<2x6xf32>
    %199 = vector.broadcast %5 : vector<1x6xf32> to vector<2x6xf32>
    %200 = arith.mulf %198, %199 : vector<2x6xf32>
    %201 = vector.broadcast %4 : vector<1x6xf32> to vector<2x6xf32>
    %202 = arith.addf %201, %200 : vector<2x6xf32>
    %203 = vector.extract_strided_slice %156 {offsets = [0, 1], sizes = [2, 1], strides = [1, 1]} : vector<2x2xf32> to vector<2x1xf32>
    %204 = vector.broadcast %203 : vector<2x1xf32> to vector<2x6xf32>
    %205 = vector.broadcast %6 : vector<1x6xf32> to vector<2x6xf32>
    %206 = arith.mulf %204, %205 : vector<2x6xf32>
    %207 = arith.addf %202, %206 : vector<2x6xf32>
    %208 = vector.extract_strided_slice %196 {offsets = [0, 0], sizes = [2, 4], strides = [1, 1]} : vector<2x6xf32> to vector<2x4xf32>
    %209 = vector.extract_strided_slice %207 {offsets = [0, 0], sizes = [2, 4], strides = [1, 1]} : vector<2x6xf32> to vector<2x4xf32>
    %210 = arith.addf %208, %209 : vector<2x4xf32>
    %cst_57 = arith.constant 5.000000e-01 : f32
    %211 = vector.broadcast %cst_57 : f32 to vector<2x4xf32>
    %212 = arith.mulf %211, %210 : vector<2x4xf32>
    %213 = math.tanh %212 : vector<2x4xf32>
    %cst_58 = arith.constant 5.000000e-01 : f32
    %214 = vector.broadcast %cst_58 : f32 to vector<2x4xf32>
    %215 = arith.mulf %214, %213 : vector<2x4xf32>
    %cst_59 = arith.constant 5.000000e-01 : f32
    %216 = vector.broadcast %cst_59 : f32 to vector<2x4xf32>
    %217 = arith.addf %215, %216 : vector<2x4xf32>
    %218 = vector.extract_strided_slice %217 {offsets = [0, 0], sizes = [2, 2], strides = [1, 1]} : vector<2x4xf32> to vector<2x2xf32>
    %219 = vector.extract_strided_slice %217 {offsets = [0, 2], sizes = [2, 2], strides = [1, 1]} : vector<2x4xf32> to vector<2x2xf32>
    %220 = vector.extract_strided_slice %196 {offsets = [0, 4], sizes = [2, 2], strides = [1, 1]} : vector<2x6xf32> to vector<2x2xf32>
    %221 = vector.extract_strided_slice %207 {offsets = [0, 4], sizes = [2, 2], strides = [1, 1]} : vector<2x6xf32> to vector<2x2xf32>
    %222 = arith.mulf %218, %221 : vector<2x2xf32>
    %223 = arith.addf %220, %222 : vector<2x2xf32>
    %224 = math.tanh %223 : vector<2x2xf32>
    %cst_60 = arith.constant 1.000000e+00 : f32
    %225 = vector.broadcast %cst_60 : f32 to vector<2x2xf32>
    %226 = arith.subf %225, %219 : vector<2x2xf32>
    %227 = arith.mulf %226, %224 : vector<2x2xf32>
    %228 = arith.mulf %219, %156 : vector<2x2xf32>
    %229 = arith.addf %227, %228 : vector<2x2xf32>
    %230 = vector.extract_strided_slice %229 {offsets = [0, 0], sizes = [2, 1], strides = [1, 1]} : vector<2x2xf32> to vector<2x1xf32>
    %231 = vector.broadcast %8 : vector<1x1xf32> to vector<2x1xf32>
    %232 = arith.mulf %230, %231 : vector<2x1xf32>
    %233 = vector.broadcast %10 : vector<1x1xf32> to vector<2x1xf32>
    %234 = arith.addf %233, %232 : vector<2x1xf32>
    %235 = vector.extract_strided_slice %229 {offsets = [0, 1], sizes = [2, 1], strides = [1, 1]} : vector<2x2xf32> to vector<2x1xf32>
    %236 = vector.broadcast %9 : vector<1x1xf32> to vector<2x1xf32>
    %237 = arith.mulf %235, %236 : vector<2x1xf32>
    %238 = arith.addf %234, %237 : vector<2x1xf32>
    %c6 = arith.constant 6 : index
    %c0_61 = arith.constant 0 : index
    %239 = vector.load %arg9[%c6, %c0_61] : memref<16x96xf32, #tpu.memory_space<vmem>>, vector<2x96xf32>
    %cst_62 = arith.constant dense<0.000000e+00> : vector<2x96xf32>
    %240 = tpu.matmul %191, %0, %cst_62 {dimension_numbers = #tpu.dot_dimension_numbers<[1], [0], [0], [1], [0, 0, 1, 1], [], []>} : vector<2x32xf32>, vector<32x96xf32>, vector<2x96xf32> -> vector<2x96xf32>
    %241 = vector.broadcast %1 : vector<1x96xf32> to vector<2x96xf32>
    %242 = arith.addf %240, %241 : vector<2x96xf32>
    %243 = vector.extract_strided_slice %239 {offsets = [0, 0], sizes = [2, 64], strides = [1, 1]} : vector<2x96xf32> to vector<2x64xf32>
    %244 = vector.extract_strided_slice %242 {offsets = [0, 0], sizes = [2, 64], strides = [1, 1]} : vector<2x96xf32> to vector<2x64xf32>
    %245 = arith.addf %243, %244 : vector<2x64xf32>
    %cst_63 = arith.constant 5.000000e-01 : f32
    %246 = vector.broadcast %cst_63 : f32 to vector<2x64xf32>
    %247 = arith.mulf %246, %245 : vector<2x64xf32>
    %248 = math.tanh %247 : vector<2x64xf32>
    %cst_64 = arith.constant 5.000000e-01 : f32
    %249 = vector.broadcast %cst_64 : f32 to vector<2x64xf32>
    %250 = arith.mulf %249, %248 : vector<2x64xf32>
    %cst_65 = arith.constant 5.000000e-01 : f32
    %251 = vector.broadcast %cst_65 : f32 to vector<2x64xf32>
    %252 = arith.addf %250, %251 : vector<2x64xf32>
    %253 = vector.extract_strided_slice %252 {offsets = [0, 0], sizes = [2, 32], strides = [1, 1]} : vector<2x64xf32> to vector<2x32xf32>
    %254 = vector.extract_strided_slice %252 {offsets = [0, 32], sizes = [2, 32], strides = [1, 1]} : vector<2x64xf32> to vector<2x32xf32>
    %255 = vector.extract_strided_slice %239 {offsets = [0, 64], sizes = [2, 32], strides = [1, 1]} : vector<2x96xf32> to vector<2x32xf32>
    %256 = vector.extract_strided_slice %242 {offsets = [0, 64], sizes = [2, 32], strides = [1, 1]} : vector<2x96xf32> to vector<2x32xf32>
    %257 = arith.mulf %253, %256 : vector<2x32xf32>
    %258 = arith.addf %255, %257 : vector<2x32xf32>
    %259 = math.tanh %258 : vector<2x32xf32>
    %cst_66 = arith.constant 1.000000e+00 : f32
    %260 = vector.broadcast %cst_66 : f32 to vector<2x32xf32>
    %261 = arith.subf %260, %254 : vector<2x32xf32>
    %262 = arith.mulf %261, %259 : vector<2x32xf32>
    %263 = arith.mulf %254, %191 : vector<2x32xf32>
    %264 = arith.addf %262, %263 : vector<2x32xf32>
    %cst_67 = arith.constant 0.000000e+00 : f32
    %265 = vector.broadcast %cst_67 : f32 to vector<2x32xf32>
    %266 = arith.maximumf %264, %265 : vector<2x32xf32>
    %cst_68 = arith.constant dense<0.000000e+00> : vector<2x6xf32>
    %267 = tpu.matmul %266, %2, %cst_68 {dimension_numbers = #tpu.dot_dimension_numbers<[1], [0], [0], [1], [0, 0, 1, 1], [], []>} : vector<2x32xf32>, vector<32x6xf32>, vector<2x6xf32> -> vector<2x6xf32>
    %268 = vector.broadcast %3 : vector<1x6xf32> to vector<2x6xf32>
    %269 = arith.addf %267, %268 : vector<2x6xf32>
    %270 = vector.extract_strided_slice %229 {offsets = [0, 0], sizes = [2, 1], strides = [1, 1]} : vector<2x2xf32> to vector<2x1xf32>
    %271 = vector.broadcast %270 : vector<2x1xf32> to vector<2x6xf32>
    %272 = vector.broadcast %5 : vector<1x6xf32> to vector<2x6xf32>
    %273 = arith.mulf %271, %272 : vector<2x6xf32>
    %274 = vector.broadcast %4 : vector<1x6xf32> to vector<2x6xf32>
    %275 = arith.addf %274, %273 : vector<2x6xf32>
    %276 = vector.extract_strided_slice %229 {offsets = [0, 1], sizes = [2, 1], strides = [1, 1]} : vector<2x2xf32> to vector<2x1xf32>
    %277 = vector.broadcast %276 : vector<2x1xf32> to vector<2x6xf32>
    %278 = vector.broadcast %6 : vector<1x6xf32> to vector<2x6xf32>
    %279 = arith.mulf %277, %278 : vector<2x6xf32>
    %280 = arith.addf %275, %279 : vector<2x6xf32>
    %281 = vector.extract_strided_slice %269 {offsets = [0, 0], sizes = [2, 4], strides = [1, 1]} : vector<2x6xf32> to vector<2x4xf32>
    %282 = vector.extract_strided_slice %280 {offsets = [0, 0], sizes = [2, 4], strides = [1, 1]} : vector<2x6xf32> to vector<2x4xf32>
    %283 = arith.addf %281, %282 : vector<2x4xf32>
    %cst_69 = arith.constant 5.000000e-01 : f32
    %284 = vector.broadcast %cst_69 : f32 to vector<2x4xf32>
    %285 = arith.mulf %284, %283 : vector<2x4xf32>
    %286 = math.tanh %285 : vector<2x4xf32>
    %cst_70 = arith.constant 5.000000e-01 : f32
    %287 = vector.broadcast %cst_70 : f32 to vector<2x4xf32>
    %288 = arith.mulf %287, %286 : vector<2x4xf32>
    %cst_71 = arith.constant 5.000000e-01 : f32
    %289 = vector.broadcast %cst_71 : f32 to vector<2x4xf32>
    %290 = arith.addf %288, %289 : vector<2x4xf32>
    %291 = vector.extract_strided_slice %290 {offsets = [0, 0], sizes = [2, 2], strides = [1, 1]} : vector<2x4xf32> to vector<2x2xf32>
    %292 = vector.extract_strided_slice %290 {offsets = [0, 2], sizes = [2, 2], strides = [1, 1]} : vector<2x4xf32> to vector<2x2xf32>
    %293 = vector.extract_strided_slice %269 {offsets = [0, 4], sizes = [2, 2], strides = [1, 1]} : vector<2x6xf32> to vector<2x2xf32>
    %294 = vector.extract_strided_slice %280 {offsets = [0, 4], sizes = [2, 2], strides = [1, 1]} : vector<2x6xf32> to vector<2x2xf32>
    %295 = arith.mulf %291, %294 : vector<2x2xf32>
    %296 = arith.addf %293, %295 : vector<2x2xf32>
    %297 = math.tanh %296 : vector<2x2xf32>
    %cst_72 = arith.constant 1.000000e+00 : f32
    %298 = vector.broadcast %cst_72 : f32 to vector<2x2xf32>
    %299 = arith.subf %298, %292 : vector<2x2xf32>
    %300 = arith.mulf %299, %297 : vector<2x2xf32>
    %301 = arith.mulf %292, %229 : vector<2x2xf32>
    %302 = arith.addf %300, %301 : vector<2x2xf32>
    %303 = vector.extract_strided_slice %302 {offsets = [0, 0], sizes = [2, 1], strides = [1, 1]} : vector<2x2xf32> to vector<2x1xf32>
    %304 = vector.broadcast %8 : vector<1x1xf32> to vector<2x1xf32>
    %305 = arith.mulf %303, %304 : vector<2x1xf32>
    %306 = vector.broadcast %10 : vector<1x1xf32> to vector<2x1xf32>
    %307 = arith.addf %306, %305 : vector<2x1xf32>
    %308 = vector.extract_strided_slice %302 {offsets = [0, 1], sizes = [2, 1], strides = [1, 1]} : vector<2x2xf32> to vector<2x1xf32>
    %309 = vector.broadcast %9 : vector<1x1xf32> to vector<2x1xf32>
    %310 = arith.mulf %308, %309 : vector<2x1xf32>
    %311 = arith.addf %307, %310 : vector<2x1xf32>
    %c8 = arith.constant 8 : index
    %c0_73 = arith.constant 0 : index
    %312 = vector.load %arg9[%c8, %c0_73] : memref<16x96xf32, #tpu.memory_space<vmem>>, vector<2x96xf32>
    %cst_74 = arith.constant dense<0.000000e+00> : vector<2x96xf32>
    %313 = tpu.matmul %264, %0, %cst_74 {dimension_numbers = #tpu.dot_dimension_numbers<[1], [0], [0], [1], [0, 0, 1, 1], [], []>} : vector<2x32xf32>, vector<32x96xf32>, vector<2x96xf32> -> vector<2x96xf32>
    %314 = vector.broadcast %1 : vector<1x96xf32> to vector<2x96xf32>
    %315 = arith.addf %313, %314 : vector<2x96xf32>
    %316 = vector.extract_strided_slice %312 {offsets = [0, 0], sizes = [2, 64], strides = [1, 1]} : vector<2x96xf32> to vector<2x64xf32>
    %317 = vector.extract_strided_slice %315 {offsets = [0, 0], sizes = [2, 64], strides = [1, 1]} : vector<2x96xf32> to vector<2x64xf32>
    %318 = arith.addf %316, %317 : vector<2x64xf32>
    %cst_75 = arith.constant 5.000000e-01 : f32
    %319 = vector.broadcast %cst_75 : f32 to vector<2x64xf32>
    %320 = arith.mulf %319, %318 : vector<2x64xf32>
    %321 = math.tanh %320 : vector<2x64xf32>
    %cst_76 = arith.constant 5.000000e-01 : f32
    %322 = vector.broadcast %cst_76 : f32 to vector<2x64xf32>
    %323 = arith.mulf %322, %321 : vector<2x64xf32>
    %cst_77 = arith.constant 5.000000e-01 : f32
    %324 = vector.broadcast %cst_77 : f32 to vector<2x64xf32>
    %325 = arith.addf %323, %324 : vector<2x64xf32>
    %326 = vector.extract_strided_slice %325 {offsets = [0, 0], sizes = [2, 32], strides = [1, 1]} : vector<2x64xf32> to vector<2x32xf32>
    %327 = vector.extract_strided_slice %325 {offsets = [0, 32], sizes = [2, 32], strides = [1, 1]} : vector<2x64xf32> to vector<2x32xf32>
    %328 = vector.extract_strided_slice %312 {offsets = [0, 64], sizes = [2, 32], strides = [1, 1]} : vector<2x96xf32> to vector<2x32xf32>
    %329 = vector.extract_strided_slice %315 {offsets = [0, 64], sizes = [2, 32], strides = [1, 1]} : vector<2x96xf32> to vector<2x32xf32>
    %330 = arith.mulf %326, %329 : vector<2x32xf32>
    %331 = arith.addf %328, %330 : vector<2x32xf32>
    %332 = math.tanh %331 : vector<2x32xf32>
    %cst_78 = arith.constant 1.000000e+00 : f32
    %333 = vector.broadcast %cst_78 : f32 to vector<2x32xf32>
    %334 = arith.subf %333, %327 : vector<2x32xf32>
    %335 = arith.mulf %334, %332 : vector<2x32xf32>
    %336 = arith.mulf %327, %264 : vector<2x32xf32>
    %337 = arith.addf %335, %336 : vector<2x32xf32>
    %cst_79 = arith.constant 0.000000e+00 : f32
    %338 = vector.broadcast %cst_79 : f32 to vector<2x32xf32>
    %339 = arith.maximumf %337, %338 : vector<2x32xf32>
    %cst_80 = arith.constant dense<0.000000e+00> : vector<2x6xf32>
    %340 = tpu.matmul %339, %2, %cst_80 {dimension_numbers = #tpu.dot_dimension_numbers<[1], [0], [0], [1], [0, 0, 1, 1], [], []>} : vector<2x32xf32>, vector<32x6xf32>, vector<2x6xf32> -> vector<2x6xf32>
    %341 = vector.broadcast %3 : vector<1x6xf32> to vector<2x6xf32>
    %342 = arith.addf %340, %341 : vector<2x6xf32>
    %343 = vector.extract_strided_slice %302 {offsets = [0, 0], sizes = [2, 1], strides = [1, 1]} : vector<2x2xf32> to vector<2x1xf32>
    %344 = vector.broadcast %343 : vector<2x1xf32> to vector<2x6xf32>
    %345 = vector.broadcast %5 : vector<1x6xf32> to vector<2x6xf32>
    %346 = arith.mulf %344, %345 : vector<2x6xf32>
    %347 = vector.broadcast %4 : vector<1x6xf32> to vector<2x6xf32>
    %348 = arith.addf %347, %346 : vector<2x6xf32>
    %349 = vector.extract_strided_slice %302 {offsets = [0, 1], sizes = [2, 1], strides = [1, 1]} : vector<2x2xf32> to vector<2x1xf32>
    %350 = vector.broadcast %349 : vector<2x1xf32> to vector<2x6xf32>
    %351 = vector.broadcast %6 : vector<1x6xf32> to vector<2x6xf32>
    %352 = arith.mulf %350, %351 : vector<2x6xf32>
    %353 = arith.addf %348, %352 : vector<2x6xf32>
    %354 = vector.extract_strided_slice %342 {offsets = [0, 0], sizes = [2, 4], strides = [1, 1]} : vector<2x6xf32> to vector<2x4xf32>
    %355 = vector.extract_strided_slice %353 {offsets = [0, 0], sizes = [2, 4], strides = [1, 1]} : vector<2x6xf32> to vector<2x4xf32>
    %356 = arith.addf %354, %355 : vector<2x4xf32>
    %cst_81 = arith.constant 5.000000e-01 : f32
    %357 = vector.broadcast %cst_81 : f32 to vector<2x4xf32>
    %358 = arith.mulf %357, %356 : vector<2x4xf32>
    %359 = math.tanh %358 : vector<2x4xf32>
    %cst_82 = arith.constant 5.000000e-01 : f32
    %360 = vector.broadcast %cst_82 : f32 to vector<2x4xf32>
    %361 = arith.mulf %360, %359 : vector<2x4xf32>
    %cst_83 = arith.constant 5.000000e-01 : f32
    %362 = vector.broadcast %cst_83 : f32 to vector<2x4xf32>
    %363 = arith.addf %361, %362 : vector<2x4xf32>
    %364 = vector.extract_strided_slice %363 {offsets = [0, 0], sizes = [2, 2], strides = [1, 1]} : vector<2x4xf32> to vector<2x2xf32>
    %365 = vector.extract_strided_slice %363 {offsets = [0, 2], sizes = [2, 2], strides = [1, 1]} : vector<2x4xf32> to vector<2x2xf32>
    %366 = vector.extract_strided_slice %342 {offsets = [0, 4], sizes = [2, 2], strides = [1, 1]} : vector<2x6xf32> to vector<2x2xf32>
    %367 = vector.extract_strided_slice %353 {offsets = [0, 4], sizes = [2, 2], strides = [1, 1]} : vector<2x6xf32> to vector<2x2xf32>
    %368 = arith.mulf %364, %367 : vector<2x2xf32>
    %369 = arith.addf %366, %368 : vector<2x2xf32>
    %370 = math.tanh %369 : vector<2x2xf32>
    %cst_84 = arith.constant 1.000000e+00 : f32
    %371 = vector.broadcast %cst_84 : f32 to vector<2x2xf32>
    %372 = arith.subf %371, %365 : vector<2x2xf32>
    %373 = arith.mulf %372, %370 : vector<2x2xf32>
    %374 = arith.mulf %365, %302 : vector<2x2xf32>
    %375 = arith.addf %373, %374 : vector<2x2xf32>
    %376 = vector.extract_strided_slice %375 {offsets = [0, 0], sizes = [2, 1], strides = [1, 1]} : vector<2x2xf32> to vector<2x1xf32>
    %377 = vector.broadcast %8 : vector<1x1xf32> to vector<2x1xf32>
    %378 = arith.mulf %376, %377 : vector<2x1xf32>
    %379 = vector.broadcast %10 : vector<1x1xf32> to vector<2x1xf32>
    %380 = arith.addf %379, %378 : vector<2x1xf32>
    %381 = vector.extract_strided_slice %375 {offsets = [0, 1], sizes = [2, 1], strides = [1, 1]} : vector<2x2xf32> to vector<2x1xf32>
    %382 = vector.broadcast %9 : vector<1x1xf32> to vector<2x1xf32>
    %383 = arith.mulf %381, %382 : vector<2x1xf32>
    %384 = arith.addf %380, %383 : vector<2x1xf32>
    %c10 = arith.constant 10 : index
    %c0_85 = arith.constant 0 : index
    %385 = vector.load %arg9[%c10, %c0_85] : memref<16x96xf32, #tpu.memory_space<vmem>>, vector<2x96xf32>
    %cst_86 = arith.constant dense<0.000000e+00> : vector<2x96xf32>
    %386 = tpu.matmul %337, %0, %cst_86 {dimension_numbers = #tpu.dot_dimension_numbers<[1], [0], [0], [1], [0, 0, 1, 1], [], []>} : vector<2x32xf32>, vector<32x96xf32>, vector<2x96xf32> -> vector<2x96xf32>
    %387 = vector.broadcast %1 : vector<1x96xf32> to vector<2x96xf32>
    %388 = arith.addf %386, %387 : vector<2x96xf32>
    %389 = vector.extract_strided_slice %385 {offsets = [0, 0], sizes = [2, 64], strides = [1, 1]} : vector<2x96xf32> to vector<2x64xf32>
    %390 = vector.extract_strided_slice %388 {offsets = [0, 0], sizes = [2, 64], strides = [1, 1]} : vector<2x96xf32> to vector<2x64xf32>
    %391 = arith.addf %389, %390 : vector<2x64xf32>
    %cst_87 = arith.constant 5.000000e-01 : f32
    %392 = vector.broadcast %cst_87 : f32 to vector<2x64xf32>
    %393 = arith.mulf %392, %391 : vector<2x64xf32>
    %394 = math.tanh %393 : vector<2x64xf32>
    %cst_88 = arith.constant 5.000000e-01 : f32
    %395 = vector.broadcast %cst_88 : f32 to vector<2x64xf32>
    %396 = arith.mulf %395, %394 : vector<2x64xf32>
    %cst_89 = arith.constant 5.000000e-01 : f32
    %397 = vector.broadcast %cst_89 : f32 to vector<2x64xf32>
    %398 = arith.addf %396, %397 : vector<2x64xf32>
    %399 = vector.extract_strided_slice %398 {offsets = [0, 0], sizes = [2, 32], strides = [1, 1]} : vector<2x64xf32> to vector<2x32xf32>
    %400 = vector.extract_strided_slice %398 {offsets = [0, 32], sizes = [2, 32], strides = [1, 1]} : vector<2x64xf32> to vector<2x32xf32>
    %401 = vector.extract_strided_slice %385 {offsets = [0, 64], sizes = [2, 32], strides = [1, 1]} : vector<2x96xf32> to vector<2x32xf32>
    %402 = vector.extract_strided_slice %388 {offsets = [0, 64], sizes = [2, 32], strides = [1, 1]} : vector<2x96xf32> to vector<2x32xf32>
    %403 = arith.mulf %399, %402 : vector<2x32xf32>
    %404 = arith.addf %401, %403 : vector<2x32xf32>
    %405 = math.tanh %404 : vector<2x32xf32>
    %cst_90 = arith.constant 1.000000e+00 : f32
    %406 = vector.broadcast %cst_90 : f32 to vector<2x32xf32>
    %407 = arith.subf %406, %400 : vector<2x32xf32>
    %408 = arith.mulf %407, %405 : vector<2x32xf32>
    %409 = arith.mulf %400, %337 : vector<2x32xf32>
    %410 = arith.addf %408, %409 : vector<2x32xf32>
    %cst_91 = arith.constant 0.000000e+00 : f32
    %411 = vector.broadcast %cst_91 : f32 to vector<2x32xf32>
    %412 = arith.maximumf %410, %411 : vector<2x32xf32>
    %cst_92 = arith.constant dense<0.000000e+00> : vector<2x6xf32>
    %413 = tpu.matmul %412, %2, %cst_92 {dimension_numbers = #tpu.dot_dimension_numbers<[1], [0], [0], [1], [0, 0, 1, 1], [], []>} : vector<2x32xf32>, vector<32x6xf32>, vector<2x6xf32> -> vector<2x6xf32>
    %414 = vector.broadcast %3 : vector<1x6xf32> to vector<2x6xf32>
    %415 = arith.addf %413, %414 : vector<2x6xf32>
    %416 = vector.extract_strided_slice %375 {offsets = [0, 0], sizes = [2, 1], strides = [1, 1]} : vector<2x2xf32> to vector<2x1xf32>
    %417 = vector.broadcast %416 : vector<2x1xf32> to vector<2x6xf32>
    %418 = vector.broadcast %5 : vector<1x6xf32> to vector<2x6xf32>
    %419 = arith.mulf %417, %418 : vector<2x6xf32>
    %420 = vector.broadcast %4 : vector<1x6xf32> to vector<2x6xf32>
    %421 = arith.addf %420, %419 : vector<2x6xf32>
    %422 = vector.extract_strided_slice %375 {offsets = [0, 1], sizes = [2, 1], strides = [1, 1]} : vector<2x2xf32> to vector<2x1xf32>
    %423 = vector.broadcast %422 : vector<2x1xf32> to vector<2x6xf32>
    %424 = vector.broadcast %6 : vector<1x6xf32> to vector<2x6xf32>
    %425 = arith.mulf %423, %424 : vector<2x6xf32>
    %426 = arith.addf %421, %425 : vector<2x6xf32>
    %427 = vector.extract_strided_slice %415 {offsets = [0, 0], sizes = [2, 4], strides = [1, 1]} : vector<2x6xf32> to vector<2x4xf32>
    %428 = vector.extract_strided_slice %426 {offsets = [0, 0], sizes = [2, 4], strides = [1, 1]} : vector<2x6xf32> to vector<2x4xf32>
    %429 = arith.addf %427, %428 : vector<2x4xf32>
    %cst_93 = arith.constant 5.000000e-01 : f32
    %430 = vector.broadcast %cst_93 : f32 to vector<2x4xf32>
    %431 = arith.mulf %430, %429 : vector<2x4xf32>
    %432 = math.tanh %431 : vector<2x4xf32>
    %cst_94 = arith.constant 5.000000e-01 : f32
    %433 = vector.broadcast %cst_94 : f32 to vector<2x4xf32>
    %434 = arith.mulf %433, %432 : vector<2x4xf32>
    %cst_95 = arith.constant 5.000000e-01 : f32
    %435 = vector.broadcast %cst_95 : f32 to vector<2x4xf32>
    %436 = arith.addf %434, %435 : vector<2x4xf32>
    %437 = vector.extract_strided_slice %436 {offsets = [0, 0], sizes = [2, 2], strides = [1, 1]} : vector<2x4xf32> to vector<2x2xf32>
    %438 = vector.extract_strided_slice %436 {offsets = [0, 2], sizes = [2, 2], strides = [1, 1]} : vector<2x4xf32> to vector<2x2xf32>
    %439 = vector.extract_strided_slice %415 {offsets = [0, 4], sizes = [2, 2], strides = [1, 1]} : vector<2x6xf32> to vector<2x2xf32>
    %440 = vector.extract_strided_slice %426 {offsets = [0, 4], sizes = [2, 2], strides = [1, 1]} : vector<2x6xf32> to vector<2x2xf32>
    %441 = arith.mulf %437, %440 : vector<2x2xf32>
    %442 = arith.addf %439, %441 : vector<2x2xf32>
    %443 = math.tanh %442 : vector<2x2xf32>
    %cst_96 = arith.constant 1.000000e+00 : f32
    %444 = vector.broadcast %cst_96 : f32 to vector<2x2xf32>
    %445 = arith.subf %444, %438 : vector<2x2xf32>
    %446 = arith.mulf %445, %443 : vector<2x2xf32>
    %447 = arith.mulf %438, %375 : vector<2x2xf32>
    %448 = arith.addf %446, %447 : vector<2x2xf32>
    %449 = vector.extract_strided_slice %448 {offsets = [0, 0], sizes = [2, 1], strides = [1, 1]} : vector<2x2xf32> to vector<2x1xf32>
    %450 = vector.broadcast %8 : vector<1x1xf32> to vector<2x1xf32>
    %451 = arith.mulf %449, %450 : vector<2x1xf32>
    %452 = vector.broadcast %10 : vector<1x1xf32> to vector<2x1xf32>
    %453 = arith.addf %452, %451 : vector<2x1xf32>
    %454 = vector.extract_strided_slice %448 {offsets = [0, 1], sizes = [2, 1], strides = [1, 1]} : vector<2x2xf32> to vector<2x1xf32>
    %455 = vector.broadcast %9 : vector<1x1xf32> to vector<2x1xf32>
    %456 = arith.mulf %454, %455 : vector<2x1xf32>
    %457 = arith.addf %453, %456 : vector<2x1xf32>
    %c12 = arith.constant 12 : index
    %c0_97 = arith.constant 0 : index
    %458 = vector.load %arg9[%c12, %c0_97] : memref<16x96xf32, #tpu.memory_space<vmem>>, vector<2x96xf32>
    %cst_98 = arith.constant dense<0.000000e+00> : vector<2x96xf32>
    %459 = tpu.matmul %410, %0, %cst_98 {dimension_numbers = #tpu.dot_dimension_numbers<[1], [0], [0], [1], [0, 0, 1, 1], [], []>} : vector<2x32xf32>, vector<32x96xf32>, vector<2x96xf32> -> vector<2x96xf32>
    %460 = vector.broadcast %1 : vector<1x96xf32> to vector<2x96xf32>
    %461 = arith.addf %459, %460 : vector<2x96xf32>
    %462 = vector.extract_strided_slice %458 {offsets = [0, 0], sizes = [2, 64], strides = [1, 1]} : vector<2x96xf32> to vector<2x64xf32>
    %463 = vector.extract_strided_slice %461 {offsets = [0, 0], sizes = [2, 64], strides = [1, 1]} : vector<2x96xf32> to vector<2x64xf32>
    %464 = arith.addf %462, %463 : vector<2x64xf32>
    %cst_99 = arith.constant 5.000000e-01 : f32
    %465 = vector.broadcast %cst_99 : f32 to vector<2x64xf32>
    %466 = arith.mulf %465, %464 : vector<2x64xf32>
    %467 = math.tanh %466 : vector<2x64xf32>
    %cst_100 = arith.constant 5.000000e-01 : f32
    %468 = vector.broadcast %cst_100 : f32 to vector<2x64xf32>
    %469 = arith.mulf %468, %467 : vector<2x64xf32>
    %cst_101 = arith.constant 5.000000e-01 : f32
    %470 = vector.broadcast %cst_101 : f32 to vector<2x64xf32>
    %471 = arith.addf %469, %470 : vector<2x64xf32>
    %472 = vector.extract_strided_slice %471 {offsets = [0, 0], sizes = [2, 32], strides = [1, 1]} : vector<2x64xf32> to vector<2x32xf32>
    %473 = vector.extract_strided_slice %471 {offsets = [0, 32], sizes = [2, 32], strides = [1, 1]} : vector<2x64xf32> to vector<2x32xf32>
    %474 = vector.extract_strided_slice %458 {offsets = [0, 64], sizes = [2, 32], strides = [1, 1]} : vector<2x96xf32> to vector<2x32xf32>
    %475 = vector.extract_strided_slice %461 {offsets = [0, 64], sizes = [2, 32], strides = [1, 1]} : vector<2x96xf32> to vector<2x32xf32>
    %476 = arith.mulf %472, %475 : vector<2x32xf32>
    %477 = arith.addf %474, %476 : vector<2x32xf32>
    %478 = math.tanh %477 : vector<2x32xf32>
    %cst_102 = arith.constant 1.000000e+00 : f32
    %479 = vector.broadcast %cst_102 : f32 to vector<2x32xf32>
    %480 = arith.subf %479, %473 : vector<2x32xf32>
    %481 = arith.mulf %480, %478 : vector<2x32xf32>
    %482 = arith.mulf %473, %410 : vector<2x32xf32>
    %483 = arith.addf %481, %482 : vector<2x32xf32>
    %cst_103 = arith.constant 0.000000e+00 : f32
    %484 = vector.broadcast %cst_103 : f32 to vector<2x32xf32>
    %485 = arith.maximumf %483, %484 : vector<2x32xf32>
    %cst_104 = arith.constant dense<0.000000e+00> : vector<2x6xf32>
    %486 = tpu.matmul %485, %2, %cst_104 {dimension_numbers = #tpu.dot_dimension_numbers<[1], [0], [0], [1], [0, 0, 1, 1], [], []>} : vector<2x32xf32>, vector<32x6xf32>, vector<2x6xf32> -> vector<2x6xf32>
    %487 = vector.broadcast %3 : vector<1x6xf32> to vector<2x6xf32>
    %488 = arith.addf %486, %487 : vector<2x6xf32>
    %489 = vector.extract_strided_slice %448 {offsets = [0, 0], sizes = [2, 1], strides = [1, 1]} : vector<2x2xf32> to vector<2x1xf32>
    %490 = vector.broadcast %489 : vector<2x1xf32> to vector<2x6xf32>
    %491 = vector.broadcast %5 : vector<1x6xf32> to vector<2x6xf32>
    %492 = arith.mulf %490, %491 : vector<2x6xf32>
    %493 = vector.broadcast %4 : vector<1x6xf32> to vector<2x6xf32>
    %494 = arith.addf %493, %492 : vector<2x6xf32>
    %495 = vector.extract_strided_slice %448 {offsets = [0, 1], sizes = [2, 1], strides = [1, 1]} : vector<2x2xf32> to vector<2x1xf32>
    %496 = vector.broadcast %495 : vector<2x1xf32> to vector<2x6xf32>
    %497 = vector.broadcast %6 : vector<1x6xf32> to vector<2x6xf32>
    %498 = arith.mulf %496, %497 : vector<2x6xf32>
    %499 = arith.addf %494, %498 : vector<2x6xf32>
    %500 = vector.extract_strided_slice %488 {offsets = [0, 0], sizes = [2, 4], strides = [1, 1]} : vector<2x6xf32> to vector<2x4xf32>
    %501 = vector.extract_strided_slice %499 {offsets = [0, 0], sizes = [2, 4], strides = [1, 1]} : vector<2x6xf32> to vector<2x4xf32>
    %502 = arith.addf %500, %501 : vector<2x4xf32>
    %cst_105 = arith.constant 5.000000e-01 : f32
    %503 = vector.broadcast %cst_105 : f32 to vector<2x4xf32>
    %504 = arith.mulf %503, %502 : vector<2x4xf32>
    %505 = math.tanh %504 : vector<2x4xf32>
    %cst_106 = arith.constant 5.000000e-01 : f32
    %506 = vector.broadcast %cst_106 : f32 to vector<2x4xf32>
    %507 = arith.mulf %506, %505 : vector<2x4xf32>
    %cst_107 = arith.constant 5.000000e-01 : f32
    %508 = vector.broadcast %cst_107 : f32 to vector<2x4xf32>
    %509 = arith.addf %507, %508 : vector<2x4xf32>
    %510 = vector.extract_strided_slice %509 {offsets = [0, 0], sizes = [2, 2], strides = [1, 1]} : vector<2x4xf32> to vector<2x2xf32>
    %511 = vector.extract_strided_slice %509 {offsets = [0, 2], sizes = [2, 2], strides = [1, 1]} : vector<2x4xf32> to vector<2x2xf32>
    %512 = vector.extract_strided_slice %488 {offsets = [0, 4], sizes = [2, 2], strides = [1, 1]} : vector<2x6xf32> to vector<2x2xf32>
    %513 = vector.extract_strided_slice %499 {offsets = [0, 4], sizes = [2, 2], strides = [1, 1]} : vector<2x6xf32> to vector<2x2xf32>
    %514 = arith.mulf %510, %513 : vector<2x2xf32>
    %515 = arith.addf %512, %514 : vector<2x2xf32>
    %516 = math.tanh %515 : vector<2x2xf32>
    %cst_108 = arith.constant 1.000000e+00 : f32
    %517 = vector.broadcast %cst_108 : f32 to vector<2x2xf32>
    %518 = arith.subf %517, %511 : vector<2x2xf32>
    %519 = arith.mulf %518, %516 : vector<2x2xf32>
    %520 = arith.mulf %511, %448 : vector<2x2xf32>
    %521 = arith.addf %519, %520 : vector<2x2xf32>
    %522 = vector.extract_strided_slice %521 {offsets = [0, 0], sizes = [2, 1], strides = [1, 1]} : vector<2x2xf32> to vector<2x1xf32>
    %523 = vector.broadcast %8 : vector<1x1xf32> to vector<2x1xf32>
    %524 = arith.mulf %522, %523 : vector<2x1xf32>
    %525 = vector.broadcast %10 : vector<1x1xf32> to vector<2x1xf32>
    %526 = arith.addf %525, %524 : vector<2x1xf32>
    %527 = vector.extract_strided_slice %521 {offsets = [0, 1], sizes = [2, 1], strides = [1, 1]} : vector<2x2xf32> to vector<2x1xf32>
    %528 = vector.broadcast %9 : vector<1x1xf32> to vector<2x1xf32>
    %529 = arith.mulf %527, %528 : vector<2x1xf32>
    %530 = arith.addf %526, %529 : vector<2x1xf32>
    %c14 = arith.constant 14 : index
    %c0_109 = arith.constant 0 : index
    %531 = vector.load %arg9[%c14, %c0_109] : memref<16x96xf32, #tpu.memory_space<vmem>>, vector<2x96xf32>
    %cst_110 = arith.constant dense<0.000000e+00> : vector<2x96xf32>
    %532 = tpu.matmul %483, %0, %cst_110 {dimension_numbers = #tpu.dot_dimension_numbers<[1], [0], [0], [1], [0, 0, 1, 1], [], []>} : vector<2x32xf32>, vector<32x96xf32>, vector<2x96xf32> -> vector<2x96xf32>
    %533 = vector.broadcast %1 : vector<1x96xf32> to vector<2x96xf32>
    %534 = arith.addf %532, %533 : vector<2x96xf32>
    %535 = vector.extract_strided_slice %531 {offsets = [0, 0], sizes = [2, 64], strides = [1, 1]} : vector<2x96xf32> to vector<2x64xf32>
    %536 = vector.extract_strided_slice %534 {offsets = [0, 0], sizes = [2, 64], strides = [1, 1]} : vector<2x96xf32> to vector<2x64xf32>
    %537 = arith.addf %535, %536 : vector<2x64xf32>
    %cst_111 = arith.constant 5.000000e-01 : f32
    %538 = vector.broadcast %cst_111 : f32 to vector<2x64xf32>
    %539 = arith.mulf %538, %537 : vector<2x64xf32>
    %540 = math.tanh %539 : vector<2x64xf32>
    %cst_112 = arith.constant 5.000000e-01 : f32
    %541 = vector.broadcast %cst_112 : f32 to vector<2x64xf32>
    %542 = arith.mulf %541, %540 : vector<2x64xf32>
    %cst_113 = arith.constant 5.000000e-01 : f32
    %543 = vector.broadcast %cst_113 : f32 to vector<2x64xf32>
    %544 = arith.addf %542, %543 : vector<2x64xf32>
    %545 = vector.extract_strided_slice %544 {offsets = [0, 0], sizes = [2, 32], strides = [1, 1]} : vector<2x64xf32> to vector<2x32xf32>
    %546 = vector.extract_strided_slice %544 {offsets = [0, 32], sizes = [2, 32], strides = [1, 1]} : vector<2x64xf32> to vector<2x32xf32>
    %547 = vector.extract_strided_slice %531 {offsets = [0, 64], sizes = [2, 32], strides = [1, 1]} : vector<2x96xf32> to vector<2x32xf32>
    %548 = vector.extract_strided_slice %534 {offsets = [0, 64], sizes = [2, 32], strides = [1, 1]} : vector<2x96xf32> to vector<2x32xf32>
    %549 = arith.mulf %545, %548 : vector<2x32xf32>
    %550 = arith.addf %547, %549 : vector<2x32xf32>
    %551 = math.tanh %550 : vector<2x32xf32>
    %cst_114 = arith.constant 1.000000e+00 : f32
    %552 = vector.broadcast %cst_114 : f32 to vector<2x32xf32>
    %553 = arith.subf %552, %546 : vector<2x32xf32>
    %554 = arith.mulf %553, %551 : vector<2x32xf32>
    %555 = arith.mulf %546, %483 : vector<2x32xf32>
    %556 = arith.addf %554, %555 : vector<2x32xf32>
    %cst_115 = arith.constant 0.000000e+00 : f32
    %557 = vector.broadcast %cst_115 : f32 to vector<2x32xf32>
    %558 = arith.maximumf %556, %557 : vector<2x32xf32>
    %cst_116 = arith.constant dense<0.000000e+00> : vector<2x6xf32>
    %559 = tpu.matmul %558, %2, %cst_116 {dimension_numbers = #tpu.dot_dimension_numbers<[1], [0], [0], [1], [0, 0, 1, 1], [], []>} : vector<2x32xf32>, vector<32x6xf32>, vector<2x6xf32> -> vector<2x6xf32>
    %560 = vector.broadcast %3 : vector<1x6xf32> to vector<2x6xf32>
    %561 = arith.addf %559, %560 : vector<2x6xf32>
    %562 = vector.extract_strided_slice %521 {offsets = [0, 0], sizes = [2, 1], strides = [1, 1]} : vector<2x2xf32> to vector<2x1xf32>
    %563 = vector.broadcast %562 : vector<2x1xf32> to vector<2x6xf32>
    %564 = vector.broadcast %5 : vector<1x6xf32> to vector<2x6xf32>
    %565 = arith.mulf %563, %564 : vector<2x6xf32>
    %566 = vector.broadcast %4 : vector<1x6xf32> to vector<2x6xf32>
    %567 = arith.addf %566, %565 : vector<2x6xf32>
    %568 = vector.extract_strided_slice %521 {offsets = [0, 1], sizes = [2, 1], strides = [1, 1]} : vector<2x2xf32> to vector<2x1xf32>
    %569 = vector.broadcast %568 : vector<2x1xf32> to vector<2x6xf32>
    %570 = vector.broadcast %6 : vector<1x6xf32> to vector<2x6xf32>
    %571 = arith.mulf %569, %570 : vector<2x6xf32>
    %572 = arith.addf %567, %571 : vector<2x6xf32>
    %573 = vector.extract_strided_slice %561 {offsets = [0, 0], sizes = [2, 4], strides = [1, 1]} : vector<2x6xf32> to vector<2x4xf32>
    %574 = vector.extract_strided_slice %572 {offsets = [0, 0], sizes = [2, 4], strides = [1, 1]} : vector<2x6xf32> to vector<2x4xf32>
    %575 = arith.addf %573, %574 : vector<2x4xf32>
    %cst_117 = arith.constant 5.000000e-01 : f32
    %576 = vector.broadcast %cst_117 : f32 to vector<2x4xf32>
    %577 = arith.mulf %576, %575 : vector<2x4xf32>
    %578 = math.tanh %577 : vector<2x4xf32>
    %cst_118 = arith.constant 5.000000e-01 : f32
    %579 = vector.broadcast %cst_118 : f32 to vector<2x4xf32>
    %580 = arith.mulf %579, %578 : vector<2x4xf32>
    %cst_119 = arith.constant 5.000000e-01 : f32
    %581 = vector.broadcast %cst_119 : f32 to vector<2x4xf32>
    %582 = arith.addf %580, %581 : vector<2x4xf32>
    %583 = vector.extract_strided_slice %582 {offsets = [0, 0], sizes = [2, 2], strides = [1, 1]} : vector<2x4xf32> to vector<2x2xf32>
    %584 = vector.extract_strided_slice %582 {offsets = [0, 2], sizes = [2, 2], strides = [1, 1]} : vector<2x4xf32> to vector<2x2xf32>
    %585 = vector.extract_strided_slice %561 {offsets = [0, 4], sizes = [2, 2], strides = [1, 1]} : vector<2x6xf32> to vector<2x2xf32>
    %586 = vector.extract_strided_slice %572 {offsets = [0, 4], sizes = [2, 2], strides = [1, 1]} : vector<2x6xf32> to vector<2x2xf32>
    %587 = arith.mulf %583, %586 : vector<2x2xf32>
    %588 = arith.addf %585, %587 : vector<2x2xf32>
    %589 = math.tanh %588 : vector<2x2xf32>
    %cst_120 = arith.constant 1.000000e+00 : f32
    %590 = vector.broadcast %cst_120 : f32 to vector<2x2xf32>
    %591 = arith.subf %590, %584 : vector<2x2xf32>
    %592 = arith.mulf %591, %589 : vector<2x2xf32>
    %593 = arith.mulf %584, %521 : vector<2x2xf32>
    %594 = arith.addf %592, %593 : vector<2x2xf32>
    %595 = vector.extract_strided_slice %594 {offsets = [0, 0], sizes = [2, 1], strides = [1, 1]} : vector<2x2xf32> to vector<2x1xf32>
    %596 = vector.broadcast %8 : vector<1x1xf32> to vector<2x1xf32>
    %597 = arith.mulf %595, %596 : vector<2x1xf32>
    %598 = vector.broadcast %10 : vector<1x1xf32> to vector<2x1xf32>
    %599 = arith.addf %598, %597 : vector<2x1xf32>
    %600 = vector.extract_strided_slice %594 {offsets = [0, 1], sizes = [2, 1], strides = [1, 1]} : vector<2x2xf32> to vector<2x1xf32>
    %601 = vector.broadcast %9 : vector<1x1xf32> to vector<2x1xf32>
    %602 = arith.mulf %600, %601 : vector<2x1xf32>
    %603 = arith.addf %599, %602 : vector<2x1xf32>
    %604 = tpu.concatenate %92, %165, %238, %311, %384, %457, %530, %603 in 1 : vector<2x1xf32>, vector<2x1xf32>, vector<2x1xf32>, vector<2x1xf32>, vector<2x1xf32>, vector<2x1xf32>, vector<2x1xf32>, vector<2x1xf32> -> vector<2x8xf32>
    %c0_121 = arith.constant 0 : index
    %c0_122 = arith.constant 0 : index
    %605 = vector.load %arg8[%c0_121, %c0_122] : memref<2x8xf32, #tpu.memory_space<vmem>>, vector<2x8xf32>
    tpu.vector_store %arg8[%c0_121, %c0_122], %604 {strides = array<i32>} : memref<2x8xf32, #tpu.memory_space<vmem>>, vector<2x8xf32>,
    return
  }
}

</mosaic_0001>

<bundles_post_ra>
// kernel: gru1_forward.1
= control target key start
LH: loop header
LB: loop body
LE: loop exit
PB: predicated region body
PF: predicated region fallthrough
CT: control target
= control target key end

     0   :  { %v2510_v3 = vmov 0.0|0.0   ;;  %vm2511_vm0 = vmmov 0   ;;  %v2512_v8 = vmov 0.0   ;;  %vm58_vm1 = vcmask 441344   ;;  %s2992_s0 = inlined_call_operand.vmem [shape: f32[16,54], index: 0, kind: input, shape index: {}]   ;;  %s2993_s1 = inlined_call_operand.vmem [shape: f32[54,96], index: 1, kind: input, shape index: {}]   ;;  %s2994_s2 = inlined_call_operand.vmem [shape: f32[32,96], index: 2, kind: input, shape index: {}]   ;;  %s2995_s3 = inlined_call_operand.vmem [shape: f32[2,96], index: 3, kind: input, shape index: {}]   ;;  %s2996_s4 = inlined_call_operand.vmem [shape: f32[32,6], index: 4, kind: input, shape index: {}]   ;;  %s2997_s5 = inlined_call_operand.vmem [shape: f32[2,6], index: 5, kind: input, shape index: {}]   ;;  %s2998_s6 = inlined_call_operand.vmem [shape: f32[2,6], index: 6, kind: input, shape index: {}]   ;;  %s2999_s7 = inlined_call_operand.vmem [shape: f32[1,3], index: 7, kind: input, shape index: {}]   ;;  %s3000_s8 = inlined_call_operand.hbm [shape: f32[2,8], index: 8, kind: output, shape index: {}]  }
   0x1   :  { %v46_v0 = vld [vmem:[%s2993_s1] sm:$0xff]  ;;  %v47_v1 = vld [vmem:[%s2993_s1 + $0x8] sm:$0xff]  ;;  %2303 = vmatprep.subr.bf16.mxu1 %v2510_v3  ;;  %v48_v6 = vld [vmem:[%s2993_s1 + $0x10] sm:$0xff]  ;;  %2123 = vmatprep.mubr.msk.f32.mxu1 %vm2511_vm0, %v2512_v8 }
   0x2   :  { %v30_v2 = vld [vmem:[%s2994_s2] sm:$0xff]  ;;  %v2291_v4 = vpack.c.bf16 %v47_v1, %v46_v0  ;;  %v31_v5 = vld [vmem:[%s2994_s2 + $0x8] sm:$0xff]  ;;  %v49_v7 = vld [vmem:[%s2993_s1 + $0x18] sm:$0xff] }
   0x3   :  { %v2592_v9 = vpack.c.bf16 %v31_v5, %v30_v2  ;;  %v2295_v10 = vpack.c.bf16 %v49_v7, %v48_v6  ;;  %v32_v11 = vld [vmem:[%s2994_s2 + $0x10] sm:$0xff]  ;;  %v33_v12 = vld [vmem:[%s2994_s2 + $0x18] sm:$0xff]  ;;  %v50_v13 = vld [vmem:[%s2993_s1 + $0x20] sm:$0xff] }
   0x4   :  { %2292 = vmatprep.subr.bf16.mxu0 %v2291_v4  ;;  %v51_v14 = vld [vmem:[%s2993_s1 + $0x28] sm:$0xff]  ;;  %v44_v15 = vld [vmem:[%s2992_s0] sm:$0xff]  ;;  %v2610_v16 = vpack.c.bf16 %v33_v12, %v32_v11 }
   0x5   :  { %2305 = vmatpush3.bf16.msra.mxu1 %v2592_v9  ;;  %2294 = vmatpush3.bf16.msra.mxu0 %v2291_v4 }
   0x6   :  { %13 = vsyncpa [#allocation4], 0  ;;  %2306 = vmatprep.subr.bf16.mxu1 %v2510_v3  ;;  %2296 = vmatprep.subr.bf16.mxu0 %v2295_v10  ;;  %v2299_v17 = vpack.c.bf16 %v51_v14, %v50_v13  ;;  %v52_v18 = vld [vmem:[%s2993_s1 + $0x30] sm:$0x3f]  ;;  %vm65_vm2 = vcmask 1045504   ;;  %v45_v19 = vld [vmem:[%s2992_s0 + $0x8] sm:$0xff] }
   0x7   :  { %2112 = vmatprep.mubr.msk.f32.mxu0 %vm58_vm1, %v44_v15  ;;  %v2636_v20 = vld [vmem:[%s2995_s3 + $0x1] ss:$0 sm:$0xff]  ;;  %s2513_s0 = smov 64   ;;  %v1984_v24 = vld [vmem:[%s2995_s3] ss:$0 sm:$0xff]  ;;  %vm144_vm3 = vcmask 785408  }
   0x8   :  { %s2514_s3 = smov 96   ;;  %vm152_vm4 = vcmask 261120   ;;  %s2516_s26 = smov 4   ;;  %vm1954_vm5 = vcmask 7168   ;;  %vm1956_vm6 = vcmask 15360   ;;  %vm1958_vm7 = vcmask 23552  }
   0x9   :  { %2308 = vmatpush3.bf16.msra.mxu1 %v2610_v16  ;;  %2298 = vmatpush3.bf16.msra.mxu0 %v2295_v10  ;;  %s2520_s28 = smov 2   ;;  %s2522_s29 = smov 1   ;;  %vm1960_vm8 = vcmask 31744   ;;  %vm1962_vm9 = vcmask 39936   ;;  %vm1964_vm10 = vcmask 48128   ;;  %vm1966_vm11 = vcmask 56320  }
   0xa   :  { %2300 = vmatprep.subr.bf16.mxu0 %v2299_v17  ;;  %2309 = vmatprep.subr.bf16.mxu1 %v2510_v3  ;;  %s2523_s1 = smov 3   ;;  %s2524_s30 = smov 5   ;;  %vm1968_vm12 = vcmask 58368  }
   0xc   :  { %2124 = vmatmul.mubr.f32.vlgmr.msra.gmra.mrb[0].mxu1 %v2512_v8 }
   0xd   :  { %2302 = vmatpush3.bf16.msra.mxu0 %v2299_v17  ;;  %2134 = vmatprep.mubr.msk.f32.mxu1 %vm2511_vm0, %v2512_v8 }
   0xe   :  { %2110 = vmatprep.subr.msk.mxu0 %vm65_vm2, %v52_v18 }
  0x11   :  { %2111 = vmatpush3.msk.msra.mxu0 %vm65_vm2, %v52_v18 }
  0x12   :  { %2113 = vmatmul.mubr.msk.f32.vlgmr.msra.gmra.mrb[0].mxu0 %vm58_vm1, %v45_v19  ;;  %2315 = vmatprep.subr.bf16.mxu0 %v2510_v3 }
  0x13   :  { %2317 = vmatpush3.bf16.msra.mxu0 %v2592_v9  ;;  %2145 = vmatprep.mubr.msk.f32.mxu0 %vm2511_vm0, %v2512_v8 }
  0x14   :  { %2318 = vmatprep.subr.bf16.mxu0 %v2510_v3 }
  0x17   :  { %2320 = vmatpush3.bf16.msra.mxu0 %v2610_v16 }
  0x18   :  { %2327 = vmatprep.subr.bf16.mxu0 %v2510_v3 }
  0xdf   :  { %v222_v21 = vpop.f32.mrb[0].mxu1 }
  0xe0   :  { %v223_v22 = vadd.f32 %v2636_v20, %v222_v21  ;;  %v2125_v23 = vpop.f32.mrb[1].mxu1 }
  0xe2   :  { %232 = vrot.lane.b32.xlu0 %v223_v22, %s2513_s0 }
  0xe5   :  { %v2114_v25 = vpop.f32.mrb[0].mxu0 }
  0xe6   :  { %v141_v26 = vadd.f32 %v2114_v25, %v1984_v24  ;;  %v135_v27 = vpop.f32.mrb[1].mxu0 }
  0xe7   :  { %v136_v28 = vadd.f32 %v1984_v24, %v135_v27 }
  0xe8   :  { %146 = vst.msk [vmem:[#allocation2 + $0x8] sm:$0xff] %vm144_vm3, %v141_v26 }
  0xe9   :  { %145 = vst.msk [vmem:[#allocation2] sm:$0xff] %vm144_vm3, %v136_v28 }
  0xf0   :  { %v147_v29 = vld [vmem:[#allocation2] sm:$0x3]  ;;  %v386_v49 = vld [vmem:[#allocation2 + $0x2] sm:$0x3]  ;;  %v606_v6 = vld [vmem:[#allocation2 + $0x4] sm:$0x3] }
  0xf1   :  { %v226_v30 = vadd.f32 %v223_v22, %v147_v29 }
  0xf3   :  { %v227_v31 = vmul.f32 0.5, %v226_v30  ;;  %v826_v30 = vld [vmem:[#allocation2 + $0x6] sm:$0x3] }
  0xf5   :  { %2422 = vtanh.f32 %v227_v31 }
  0xff   :  { %v2423_v32 = vpop.eup %2422 }
 0x100   :  { %v229_v33 = vmul.f32 0.5, %v2423_v32 }
 0x102   :  { %v230_v34 = vadd.f32 0.5, %v229_v33 }
 0x104   :  { %v242_v40 = vsub.f32 1.0, %v230_v34  ;;  %v248_v42 = vmul.f32 0.0, %v230_v34 }
 0x154   :  { %v233_v35 = vpop.permute.xlu0 %232 }
 0x155   :  { %v235_v36 = vmul.f32 %v233_v35, %v230_v34 }
 0x157   :  { %237 = vrot.lane.b32.xlu0 %v235_v36, %s2513_s0 }
 0x1c9   :  { %v238_v37 = vpop.permute.xlu0 %237 }
 0x1ca   :  { %v240_v38 = vadd.f32 %v238_v37, %v147_v29 }
 0x1cc   :  { %2424 = vtanh.f32 %v240_v38  ;;  %v35_v38 = vld [vmem:[%s2996_s4] sm:$0xff] }
 0x1d6   :  { %v2425_v39 = vpop.eup %2424 }
 0x1d7   :  { %244 = vrot.lane.b32.xlu1 %v2425_v39, %s2514_s3  ;;  %v36_v39 = vld [vmem:[%s2996_s4 + $0x8] sm:$0xff] }
 0x249   :  { %v245_v41 = vpop.permute.xlu1 %244 }
 0x24a   :  { %v247_v43 = vmul.f32 %v245_v41, %v242_v40  ;;  %v2697_v40 = vpack.c.bf16 %v36_v39, %v35_v38  ;;  %v37_v41 = vld [vmem:[%s2996_s4 + $0x10] sm:$0xff] }
 0x24c   :  { %v2645_v44 = vadd.f32 %v248_v42, %v247_v43  ;;  %2311 = vmatpush3.bf16.msra.mxu1 %v2697_v40  ;;  %v38_v42 = vld [vmem:[%s2996_s4 + $0x18] sm:$0xff] }
 0x24d   :  { %2312 = vmatprep.subr.bf16.mxu1 %v2510_v3 }
 0x24e   :  { %388 = vrot.lane.b32.xlu1 %v2645_v44, %s2514_s3 }
 0x2c0   :  { %v389_v45 = vpop.permute.xlu1 %388 }
 0x2c1   :  { %2146 = vmatmul.mubr.msk.f32.vlgmr.msra.gmra.mrb[2].mxu0 %vm152_vm4, %v389_v45  ;;  %v2707_v45 = vpack.c.bf16 %v38_v42, %v37_v41 }
 0x2c2   :  { %2329 = vmatpush3.bf16.msra.mxu0 %v2592_v9  ;;  %2167 = vmatprep.mubr.msk.f32.mxu0 %vm2511_vm0, %v2512_v8 }
 0x2c3   :  { %2330 = vmatprep.subr.bf16.mxu0 %v2510_v3  ;;  %2314 = vmatpush3.bf16.msra.mxu1 %v2707_v45 }
 0x2c4   :  { %2321 = vmatprep.subr.bf16.mxu1 %v2510_v3 }
 0x2c6   :  { %2332 = vmatpush3.bf16.msra.mxu0 %v2610_v16 }
 0x2c7   :  { %2339 = vmatprep.subr.bf16.mxu0 %v2510_v3 }
 0x394   :  { %v458_v46 = vpop.f32.mrb[2].mxu0 }
 0x395   :  { %v459_v47 = vadd.f32 %v2636_v20, %v458_v46  ;;  %v2147_v48 = vpop.f32.mrb[3].mxu0 }
 0x396   :  { %v250_v48 = vmax.f32 %v2645_v44, 0.0 }
 0x397   :  { %468 = vrot.lane.b32.xlu0 %v459_v47, %s2513_s0  ;;  %v462_v50 = vadd.f32 %v459_v47, %v386_v49 }
 0x399   :  { %v463_v51 = vmul.f32 0.5, %v462_v50 }
 0x39b   :  { %2426 = vtanh.f32 %v463_v51  ;;  %v2723_v51 = vld [vmem:[%s2998_s6 + $0x1] ss:$0 sm:$0xff] }
 0x3a5   :  { %v2427_v52 = vpop.eup %2426 }
 0x3a6   :  { %v465_v53 = vmul.f32 0.5, %v2427_v52  ;;  %v2728_v52 = vld [vmem:[%s2997_s5 + $0x1] ss:$0 sm:$0xff] }
 0x3a8   :  { %v466_v54 = vadd.f32 0.5, %v465_v53 }
 0x3aa   :  { %v478_v60 = vsub.f32 1.0, %v466_v54  ;;  %v484_v62 = vmul.f32 %v466_v54, %v2645_v44 }
 0x409   :  { %v469_v55 = vpop.permute.xlu0 %468 }
 0x40a   :  { %v471_v56 = vmul.f32 %v469_v55, %v466_v54 }
 0x40c   :  { %473 = vrot.lane.b32.xlu1 %v471_v56, %s2513_s0 }
 0x47e   :  { %v474_v57 = vpop.permute.xlu1 %473 }
 0x47f   :  { %v476_v58 = vadd.f32 %v474_v57, %v386_v49  ;;  %v2717_v49 = vld [vmem:[%s2997_s5] ss:$0 sm:$0xff]  ;;  %v344_v57 = vmul.f32 0.0, %v2728_v52  ;;  %s2515_s5 = smov 124  }
 0x480   :  { %v334_v50 = vmul.f32 0.0, %v2717_v49 }
 0x481   :  { %2428 = vtanh.f32 %v476_v58 }
 0x482   :  { %v339_v56 = vadd.f32 %v2723_v51, %v334_v50 }
 0x48b   :  { %v2429_v59 = vpop.eup %2428 }
 0x48c   :  { %480 = vrot.lane.b32.xlu0 %v2429_v59, %s2514_s3 }
 0x4fe   :  { %v481_v61 = vpop.permute.xlu0 %480 }
 0x4ff   :  { %v483_v63 = vmul.f32 %v481_v61, %v478_v60  ;;  %v345_v60 = vadd.f32 %v344_v57, %v339_v56 }
 0x501   :  { %v2661_v0 = vadd.f32 %v484_v62, %v483_v63 }
 0x503   :  { %608 = vrot.lane.b32.xlu1 %v2661_v0, %s2514_s3  ;;  %v486_v61 = vmax.f32 %v2661_v0, 0.0 }
 0x575   :  { %v609_v1 = vpop.permute.xlu1 %608 }
 0x576   :  { %2168 = vmatmul.mubr.msk.f32.vlgmr.msra.gmra.mrb[4].mxu0 %vm152_vm4, %v609_v1 }
 0x577   :  { %2341 = vmatpush3.bf16.msra.mxu0 %v2592_v9  ;;  %2189 = vmatprep.mubr.msk.f32.mxu0 %vm2511_vm0, %v2512_v8 }
 0x578   :  { %2342 = vmatprep.subr.bf16.mxu0 %v2510_v3 }
 0x57b   :  { %2344 = vmatpush3.bf16.msra.mxu0 %v2610_v16 }
 0x57c   :  { %2351 = vmatprep.subr.bf16.mxu0 %v2510_v3 }
 0x649   :  { %v678_v2 = vpop.f32.mrb[4].mxu0 }
 0x64a   :  { %v679_v4 = vadd.f32 %v2636_v20, %v678_v2  ;;  %v2169_v5 = vpop.f32.mrb[5].mxu0 }
 0x64c   :  { %688 = vrot.lane.b32.xlu0 %v679_v4, %s2513_s0  ;;  %v682_v7 = vadd.f32 %v679_v4, %v606_v6  ;;  %v2764_v4 = vld [vmem:[%s2998_s6] ss:$0 sm:$0xff]  ;;  %s2519_s6 = smov 126  }
 0x64e   :  { %v683_v10 = vmul.f32 0.5, %v682_v7 }
 0x650   :  { %2430 = vtanh.f32 %v683_v10 }
 0x65a   :  { %v2431_v11 = vpop.eup %2430 }
 0x65b   :  { %v685_v12 = vmul.f32 0.5, %v2431_v11 }
 0x65d   :  { %v686_v13 = vadd.f32 0.5, %v685_v12 }
 0x65f   :  { %v698_v21 = vsub.f32 1.0, %v686_v13  ;;  %v704_v23 = vmul.f32 %v686_v13, %v2661_v0 }
 0x6be   :  { %v689_v14 = vpop.permute.xlu0 %688 }
 0x6bf   :  { %v691_v15 = vmul.f32 %v689_v14, %v686_v13 }
 0x6c1   :  { %693 = vrot.lane.b32.xlu1 %v691_v15, %s2513_s0 }
 0x733   :  { %v694_v17 = vpop.permute.xlu1 %693 }
 0x734   :  { %v696_v18 = vadd.f32 %v694_v17, %v606_v6 }
 0x736   :  { %2432 = vtanh.f32 %v696_v18 }
 0x740   :  { %v2433_v19 = vpop.eup %2432 }
 0x741   :  { %700 = vrot.lane.b32.xlu0 %v2433_v19, %s2514_s3 }
 0x7b3   :  { %v701_v22 = vpop.permute.xlu0 %700 }
 0x7b4   :  { %v703_v24 = vmul.f32 %v701_v22, %v698_v21  ;;  %v1046_v21 = vld [vmem:[#allocation2 + $0x8] sm:$0x3] }
 0x7b6   :  { %v2677_v25 = vadd.f32 %v704_v23, %v703_v24 }
 0x7b8   :  { %828 = vrot.lane.b32.xlu1 %v2677_v25, %s2514_s3 }
 0x82a   :  { %v829_v26 = vpop.permute.xlu1 %828 }
 0x82b   :  { %2190 = vmatmul.mubr.msk.f32.vlgmr.msra.gmra.mrb[6].mxu0 %vm152_vm4, %v829_v26 }
 0x82c   :  { %2353 = vmatpush3.bf16.msra.mxu0 %v2592_v9  ;;  %2211 = vmatprep.mubr.msk.f32.mxu0 %vm2511_vm0, %v2512_v8 }
 0x82d   :  { %2354 = vmatprep.subr.bf16.mxu0 %v2510_v3 }
 0x830   :  { %2356 = vmatpush3.bf16.msra.mxu0 %v2610_v16 }
 0x831   :  { %2363 = vmatprep.subr.bf16.mxu0 %v2510_v3 }
 0x8fe   :  { %v898_v27 = vpop.f32.mrb[6].mxu0 }
 0x8ff   :  { %v899_v28 = vadd.f32 %v2636_v20, %v898_v27  ;;  %v2191_v29 = vpop.f32.mrb[7].mxu0 }
 0x901   :  { %908 = vrot.lane.b32.xlu0 %v899_v28, %s2513_s0  ;;  %v902_v31 = vadd.f32 %v899_v28, %v826_v30 }
 0x903   :  { %v903_v32 = vmul.f32 0.5, %v902_v31 }
 0x905   :  { %2434 = vtanh.f32 %v903_v32  ;;  %v2517_v32 = vmov 3  }
 0x906   :  { %2416 = vset.pattern.permute.xlu1 %v2517_v32 }
 0x90f   :  { %v2435_v33 = vpop.eup %2434 }
 0x910   :  { %v905_v34 = vmul.f32 0.5, %v2435_v33  ;;  %v2518_v33 = vmov 2  }
 0x911   :  { %2415 = vset.pattern.permute.xlu0 %v2518_v33 }
 0x912   :  { %v906_v35 = vadd.f32 0.5, %v905_v34 }
 0x914   :  { %v918_v44 = vsub.f32 1.0, %v906_v35  ;;  %v924_v54 = vmul.f32 %v906_v35, %v2677_v25 }
 0x973   :  { %v909_v36 = vpop.permute.xlu0 %908 }
 0x974   :  { %v911_v37 = vmul.f32 %v909_v36, %v906_v35 }
 0x976   :  { %913 = vrot.lane.b32.xlu1 %v911_v37, %s2513_s0 }
 0x9e8   :  { %v914_v43 = vpop.permute.xlu1 %913 }
 0x9e9   :  { %v916_v46 = vadd.f32 %v914_v43, %v826_v30 }
 0x9eb   :  { %2436 = vtanh.f32 %v916_v46 }
 0x9f5   :  { %v2437_v47 = vpop.eup %2436 }
 0x9f6   :  { %920 = vrot.lane.b32.xlu0 %v2437_v47, %s2514_s3 }
 0x9fa   :  { %256 = vrot.lane.b32.xlu0 %v250_v48, %s2514_s3 }
 0xa68   :  { %v921_v53 = vpop.permute.xlu0 %920 }
 0xa69   :  { %v923_v55 = vmul.f32 %v921_v53, %v918_v44  ;;  %v706_v53 = vmax.f32 %v2677_v25, 0.0 }
 0xa6b   :  { %v2733_v58 = vadd.f32 %v924_v54, %v923_v55 }
 0xa6c   :  { %v257_v59 = vpop.permute.xlu0 %256 }
 0xa6d   :  { %1048 = vrot.lane.b32.xlu1 %v2733_v58, %s2514_s3  ;;  %2135 = vmatmul.mubr.msk.f32.vlgmr.msra.gmra.mrb[2].mxu1 %vm152_vm4, %v257_v59 }
 0xa6e   :  { %2323 = vmatpush3.bf16.msra.mxu1 %v2697_v40  ;;  %2156 = vmatprep.mubr.msk.f32.mxu1 %vm2511_vm0, %v2512_v8 }
 0xa6f   :  { %2324 = vmatprep.subr.bf16.mxu1 %v2510_v3 }
 0xa71   :  { %352 = vrot.lane.b32.xlu1 %v345_v60, %s2515_s5 }
 0xa72   :  { %2326 = vmatpush3.bf16.msra.mxu1 %v2707_v45 }
 0xa73   :  { %2333 = vmatprep.subr.bf16.mxu1 %v2510_v3 }
 0xa75   :  { %488 = vrot.lane.b32.xlu1 %v486_v61, %s2514_s3 }
 0xadf   :  { %v1049_v62 = vpop.permute.xlu1 %1048 }
 0xae0   :  { %2212 = vmatmul.mubr.msk.f32.vlgmr.msra.gmra.mrb[8].mxu0 %vm152_vm4, %v1049_v62 }
 0xae1   :  { %2365 = vmatpush3.bf16.msra.mxu0 %v2592_v9  ;;  %2233 = vmatprep.mubr.msk.f32.mxu0 %vm2511_vm0, %v2512_v8 }
 0xae2   :  { %2366 = vmatprep.subr.bf16.mxu0 %v2510_v3 }
 0xae3   :  { %v353_v63 = vpop.permute.xlu1 %352 }
 0xae5   :  { %2368 = vmatpush3.bf16.msra.mxu0 %v2610_v16 }
 0xae6   :  { %2375 = vmatprep.subr.bf16.mxu0 %v2510_v3 }
 0xae7   :  { %v489_v0 = vpop.permute.xlu1 %488 }
 0xae8   :  { %2157 = vmatmul.mubr.msk.f32.vlgmr.msra.gmra.mrb[4].mxu1 %vm152_vm4, %v489_v0 }
 0xae9   :  { %2335 = vmatpush3.bf16.msra.mxu1 %v2697_v40  ;;  %2178 = vmatprep.mubr.msk.f32.mxu1 %vm2511_vm0, %v2512_v8 }
 0xaea   :  { %2336 = vmatprep.subr.bf16.mxu1 %v2510_v3 }
 0xaed   :  { %2338 = vmatpush3.bf16.msra.mxu1 %v2707_v45 }
 0xaee   :  { %2345 = vmatprep.subr.bf16.mxu1 %v2510_v3 }
 0xb40   :  { %v326_v1 = vpop.f32.mrb[2].mxu1 }
 0xb41   :  { %v2136_v2 = vpop.f32.mrb[3].mxu1  ;;  %v327_v5 = vadd.f32 %v2764_v4, %v326_v1 }
 0xb43   :  { %v346_v6 = vadd.f32 %v345_v60, %v327_v5 }
 0xb45   :  { %v347_v7 = vmul.f32 0.5, %v346_v6 }
 0xb47   :  { %2438 = vtanh.f32 %v347_v7 }
 0xb51   :  { %v2439_v10 = vpop.eup %2438 }
 0xb52   :  { %v349_v11 = vmul.f32 0.5, %v2439_v10 }
 0xb54   :  { %v350_v13 = vadd.f32 0.5, %v349_v11 }
 0xb56   :  { %v355_v17 = vmul.f32 %v353_v63, %v350_v13  ;;  %v362_v38 = vsub.f32 1.0, %v350_v13  ;;  %v368_v41 = vmul.f32 0.0, %v350_v13 }
 0xbb3   :  { %v1118_v12 = vpop.f32.mrb[8].mxu0 }
 0xbb4   :  { %v1119_v14 = vadd.f32 %v2636_v20, %v1118_v12  ;;  %v2213_v15 = vpop.f32.mrb[9].mxu0 }
 0xbb6   :  { %1128 = vrot.lane.b32.xlu0 %v1119_v14, %s2513_s0  ;;  %v1122_v22 = vadd.f32 %v1119_v14, %v1046_v21 }
 0xbb8   :  { %v1123_v23 = vmul.f32 0.5, %v1122_v22 }
 0xbba   :  { %357 = vrot.lane.b32.xlu0 %v355_v17, %s2516_s26  ;;  %2440 = vtanh.f32 %v1123_v23 }
 0xbbb   :  { %v558_v18 = vpop.f32.mrb[4].mxu1 }
 0xbbc   :  { %v2158_v19 = vpop.f32.mrb[5].mxu1  ;;  %v559_v61 = vadd.f32 %v2764_v4, %v558_v18 }
 0xbc4   :  { %v2441_v24 = vpop.eup %2440 }
 0xbc5   :  { %v1125_v26 = vmul.f32 0.5, %v2441_v24 }
 0xbc7   :  { %v1126_v27 = vadd.f32 0.5, %v1125_v26  ;;  %v1266_v26 = vld [vmem:[#allocation2 + $0xa] sm:$0x3] }
 0xbc9   :  { %v1138_v46 = vsub.f32 1.0, %v1126_v27  ;;  %v1144_v48 = vmul.f32 %v1126_v27, %v2733_v58 }
 0xc28   :  { %v1129_v28 = vpop.permute.xlu0 %1128 }
 0xc29   :  { %v1131_v29 = vmul.f32 %v1129_v28, %v1126_v27 }
 0xc2b   :  { %1133 = vrot.lane.b32.xlu1 %v1131_v29, %s2513_s0 }
 0xc2c   :  { %v358_v30 = vpop.permute.xlu0 %357 }
 0xc2d   :  { %v360_v31 = vadd.f32 %v358_v30, %v327_v5 }
 0xc2f   :  { %2442 = vtanh.f32 %v360_v31 }
 0xc39   :  { %v2443_v34 = vpop.eup %2442 }
 0xc3a   :  { %364 = vrot.lane.b32.xlu0 %v2443_v34, %s2519_s6 }
 0xc9d   :  { %v1134_v35 = vpop.permute.xlu1 %1133 }
 0xc9e   :  { %v1136_v36 = vadd.f32 %v1134_v35, %v1046_v21 }
 0xca0   :  { %2444 = vtanh.f32 %v1136_v36 }
 0xcaa   :  { %v2445_v37 = vpop.eup %2444 }
 0xcab   :  { %1140 = vrot.lane.b32.xlu1 %v2445_v37, %s2514_s3 }
 0xcac   :  { %v365_v39 = vpop.permute.xlu0 %364 }
 0xcad   :  { %v367_v42 = vmul.f32 %v365_v39, %v362_v38 }
 0xcaf   :  { %v2775_v43 = vadd.f32 %v368_v41, %v367_v42 }
 0xcb1   :  { %570 = vperm.xlu1 %2416, %v2775_v43   ;;  %564 = vperm.xlu0 %2415, %v2775_v43  }
 0xd1d   :  { %v1141_v47 = vpop.permute.xlu1 %1140 }
 0xd1e   :  { %v1143_v50 = vmul.f32 %v1141_v47, %v1138_v46  ;;  %v926_v46 = vmax.f32 %v2733_v58, 0.0 }
 0xd20   :  { %v2780_v44 = vadd.f32 %v1144_v48, %v1143_v50 }
 0xd22   :  { %1268 = vrot.lane.b32.xlu1 %v2780_v44, %s2514_s3 }
 0xd26   :  { %708 = vrot.lane.b32.xlu1 %v706_v53, %s2514_s3 }
 0xd30   :  { %v571_v54 = vpop.permute.xlu1 %570  ;;  %v565_v55 = vpop.permute.xlu0 %564 }
 0xd31   :  { %v567_v56 = vmul.f32 %v2717_v49, %v565_v55  ;;  %v573_v57 = vmul.f32 %v2728_v52, %v571_v54 }
 0xd33   :  { %v568_v59 = vadd.f32 %v2723_v51, %v567_v56 }
 0xd35   :  { %v574_v60 = vadd.f32 %v573_v57, %v568_v59 }
 0xd37   :  { %581 = vrot.lane.b32.xlu0 %v574_v60, %s2515_s5  ;;  %v575_v62 = vadd.f32 %v574_v60, %v559_v61 }
 0xd39   :  { %v576_v63 = vmul.f32 0.5, %v575_v62 }
 0xd3b   :  { %2446 = vtanh.f32 %v576_v63 }
 0xd45   :  { %v2447_v1 = vpop.eup %2446 }
 0xd46   :  { %v578_v2 = vmul.f32 0.5, %v2447_v1 }
 0xd48   :  { %v579_v5 = vadd.f32 0.5, %v578_v2 }
 0xd4a   :  { %v591_v18 = vsub.f32 1.0, %v579_v5  ;;  %v597_v21 = vmul.f32 %v579_v5, %v2775_v43 }
 0xd94   :  { %v1269_v0 = vpop.permute.xlu1 %1268 }
 0xd95   :  { %2234 = vmatmul.mubr.msk.f32.vlgmr.msra.gmra.mrb[10].mxu0 %vm152_vm4, %v1269_v0 }
 0xd96   :  { %2377 = vmatpush3.bf16.msra.mxu0 %v2592_v9  ;;  %2255 = vmatprep.mubr.msk.f32.mxu0 %vm2511_vm0, %v2512_v8 }
 0xd97   :  { %2378 = vmatprep.subr.bf16.mxu0 %v2510_v3 }
 0xd98   :  { %v709_v25 = vpop.permute.xlu1 %708 }
 0xd99   :  { %2179 = vmatmul.mubr.msk.f32.vlgmr.msra.gmra.mrb[6].mxu1 %vm152_vm4, %v709_v25 }
 0xd9a   :  { %2347 = vmatpush3.bf16.msra.mxu1 %v2697_v40  ;;  %2200 = vmatprep.mubr.msk.f32.mxu1 %vm2511_vm0, %v2512_v8 }
 0xd9b   :  { %2348 = vmatprep.subr.bf16.mxu1 %v2510_v3  ;;  %2380 = vmatpush3.bf16.msra.mxu0 %v2610_v16 }
 0xd9c   :  { %2387 = vmatprep.subr.bf16.mxu0 %v2510_v3 }
 0xd9e   :  { %2350 = vmatpush3.bf16.msra.mxu1 %v2707_v45 }
 0xd9f   :  { %2357 = vmatprep.subr.bf16.mxu1 %v2510_v3 }
 0xda9   :  { %v582_v6 = vpop.permute.xlu0 %581 }
 0xdaa   :  { %v584_v7 = vmul.f32 %v582_v6, %v579_v5 }
 0xdac   :  { %586 = vrot.lane.b32.xlu0 %v584_v7, %s2516_s26 }
 0xe1e   :  { %v587_v10 = vpop.permute.xlu0 %586 }
 0xe1f   :  { %v589_v11 = vadd.f32 %v587_v10, %v559_v61 }
 0xe21   :  { %2448 = vtanh.f32 %v589_v11 }
 0xe2b   :  { %v2449_v12 = vpop.eup %2448 }
 0xe2c   :  { %593 = vrot.lane.b32.xlu1 %v2449_v12, %s2519_s6 }
 0xe68   :  { %v1338_v13 = vpop.f32.mrb[10].mxu0 }
 0xe69   :  { %v2235_v14 = vpop.f32.mrb[11].mxu0  ;;  %v1339_v24 = vadd.f32 %v2636_v20, %v1338_v13 }
 0xe6b   :  { %v1342_v27 = vadd.f32 %v1339_v24, %v1266_v26 }
 0xe6c   :  { %v778_v15 = vpop.f32.mrb[6].mxu1 }
 0xe6d   :  { %v2180_v17 = vpop.f32.mrb[7].mxu1  ;;  %v1343_v28 = vmul.f32 0.5, %v1342_v27  ;;  %v779_v47 = vadd.f32 %v2764_v4, %v778_v15 }
 0xe6f   :  { %2450 = vtanh.f32 %v1343_v28 }
 0xe79   :  { %v2451_v29 = vpop.eup %2450 }
 0xe7a   :  { %v1345_v30 = vmul.f32 0.5, %v2451_v29 }
 0xe7c   :  { %v1346_v38 = vadd.f32 0.5, %v1345_v30 }
 0xe7e   :  { %v1358_v0 = vsub.f32 1.0, %v1346_v38  ;;  %v1364_v1 = vmul.f32 %v1346_v38, %v2780_v44 }
 0xe9e   :  { %v594_v19 = vpop.permute.xlu1 %593 }
 0xe9f   :  { %v596_v22 = vmul.f32 %v594_v19, %v591_v18  ;;  %v1146_v18 = vmax.f32 %v2780_v44, 0.0 }
 0xea1   :  { %v2808_v23 = vadd.f32 %v597_v21, %v596_v22 }
 0xea3   :  { %790 = vperm.xlu1 %2416, %v2808_v23   ;;  %784 = vperm.xlu0 %2415, %v2808_v23  }
 0xea7   :  { %1348 = vrot.lane.b32.xlu0 %v1339_v24, %s2513_s0 }
 0xf22   :  { %v791_v31 = vpop.permute.xlu1 %790  ;;  %v785_v34 = vpop.permute.xlu0 %784 }
 0xf23   :  { %v787_v35 = vmul.f32 %v2717_v49, %v785_v34  ;;  %v793_v36 = vmul.f32 %v2728_v52, %v791_v31 }
 0xf25   :  { %v788_v37 = vadd.f32 %v2723_v51, %v787_v35 }
 0xf26   :  { %v1349_v39 = vpop.permute.xlu0 %1348 }
 0xf27   :  { %v1351_v41 = vmul.f32 %v1349_v39, %v1346_v38  ;;  %v794_v42 = vadd.f32 %v793_v36, %v788_v37 }
 0xf29   :  { %801 = vrot.lane.b32.xlu1 %v794_v42, %s2515_s5  ;;  %1353 = vrot.lane.b32.xlu0 %v1351_v41, %s2513_s0  ;;  %v795_v48 = vadd.f32 %v794_v42, %v779_v47 }
 0xf2b   :  { %v796_v50 = vmul.f32 0.5, %v795_v48  ;;  %v1486_v48 = vld [vmem:[#allocation2 + $0xc] sm:$0x3] }
 0xf2d   :  { %928 = vrot.lane.b32.xlu1 %v926_v46, %s2514_s3  ;;  %2452 = vtanh.f32 %v796_v50 }
 0xf37   :  { %v2453_v53 = vpop.eup %2452 }
 0xf38   :  { %v798_v54 = vmul.f32 0.5, %v2453_v53 }
 0xf3a   :  { %v799_v55 = vadd.f32 0.5, %v798_v54 }
 0xf3c   :  { %v811_v11 = vsub.f32 1.0, %v799_v55  ;;  %v817_v13 = vmul.f32 %v799_v55, %v2808_v23 }
 0xf9b   :  { %v802_v56 = vpop.permute.xlu1 %801  ;;  %v1354_v57 = vpop.permute.xlu0 %1353 }
 0xf9c   :  { %v804_v59 = vmul.f32 %v802_v56, %v799_v55  ;;  %v1356_v60 = vadd.f32 %v1354_v57, %v1266_v26 }
 0xf9e   :  { %2454 = vtanh.f32 %v1356_v60  ;;  %806 = vrot.lane.b32.xlu0 %v804_v59, %s2516_s26 }
 0xf9f   :  { %v929_v61 = vpop.permute.xlu1 %928 }
 0xfa0   :  { %2201 = vmatmul.mubr.msk.f32.vlgmr.msra.gmra.mrb[8].mxu1 %vm152_vm4, %v929_v61 }
 0xfa1   :  { %2359 = vmatpush3.bf16.msra.mxu1 %v2697_v40  ;;  %2222 = vmatprep.mubr.msk.f32.mxu1 %vm2511_vm0, %v2512_v8 }
 0xfa2   :  { %2360 = vmatprep.subr.bf16.mxu1 %v2510_v3 }
 0xfa5   :  { %2362 = vmatpush3.bf16.msra.mxu1 %v2707_v45 }
 0xfa6   :  { %2369 = vmatprep.subr.bf16.mxu1 %v2510_v3 }
 0xfa8   :  { %v2455_v58 = vpop.eup %2454 }
 0xfa9   :  { %1360 = vrot.lane.b32.xlu1 %v2455_v58, %s2514_s3 }
0x1010   :  { %v807_v62 = vpop.permute.xlu0 %806 }
0x1011   :  { %v809_v63 = vadd.f32 %v807_v62, %v779_v47 }
0x1013   :  { %2456 = vtanh.f32 %v809_v63 }
0x101b   :  { %v1361_v25 = vpop.permute.xlu1 %1360 }
0x101c   :  { %v1363_v2 = vmul.f32 %v1361_v25, %v1358_v0 }
0x101d   :  { %v2457_v5 = vpop.eup %2456 }
0x101e   :  { %v2832_v6 = vadd.f32 %v1364_v1, %v1363_v2  ;;  %813 = vrot.lane.b32.xlu0 %v2457_v5, %s2519_s6 }
0x1020   :  { %1488 = vrot.lane.b32.xlu1 %v2832_v6, %s2514_s3 }
0x1073   :  { %v998_v7 = vpop.f32.mrb[8].mxu1 }
0x1074   :  { %v2202_v10 = vpop.f32.mrb[9].mxu1  ;;  %v999_v28 = vadd.f32 %v2764_v4, %v998_v7 }
0x1090   :  { %v814_v12 = vpop.permute.xlu0 %813 }
0x1091   :  { %v816_v14 = vmul.f32 %v814_v12, %v811_v11  ;;  %v1366_v12 = vmax.f32 %v2832_v6, 0.0 }
0x1092   :  { %v1489_v15 = vpop.permute.xlu1 %1488 }
0x1093   :  { %v2838_v17 = vadd.f32 %v817_v13, %v816_v14  ;;  %2256 = vmatmul.mubr.msk.f32.vlgmr.msra.gmra.mrb[12].mxu0 %vm152_vm4, %v1489_v15 }
0x1094   :  { %2389 = vmatpush3.bf16.msra.mxu0 %v2592_v9  ;;  %2277 = vmatprep.mubr.msk.f32.mxu0 %vm2511_vm0, %v2512_v8 }
0x1095   :  { %1010 = vperm.xlu1 %2416, %v2838_v17   ;;  %1004 = vperm.xlu0 %2415, %v2838_v17  }
0x1096   :  { %2390 = vmatprep.subr.bf16.mxu0 %v2510_v3 }
0x1098   :  { %2392 = vmatpush3.bf16.msra.mxu0 %v2610_v16 }
0x1099   :  { %1148 = vrot.lane.b32.xlu1 %v1146_v18, %s2514_s3  ;;  %2418 = vset.pattern.permute.xlu0 %v2517_v32 }
0x109a   :  { %2417 = vset.pattern.permute.xlu1 %v2518_v33 }
0x1114   :  { %v1011_v9 = vpop.permute.xlu1 %1010  ;;  %v1005_v19 = vpop.permute.xlu0 %1004 }
0x1115   :  { %v1007_v21 = vmul.f32 %v2717_v49, %v1005_v19  ;;  %v1013_v22 = vmul.f32 %v2728_v52, %v1011_v9 }
0x1117   :  { %v1008_v24 = vadd.f32 %v2723_v51, %v1007_v21 }
0x1118   :  { %v1149_v26 = vpop.permute.xlu1 %1148 }
0x1119   :  { %2223 = vmatmul.mubr.msk.f32.vlgmr.msra.gmra.mrb[10].mxu1 %vm152_vm4, %v1149_v26  ;;  %v1014_v44 = vadd.f32 %v1013_v22, %v1008_v24 }
0x111a   :  { %2371 = vmatpush3.bf16.msra.mxu1 %v2697_v40  ;;  %2244 = vmatprep.mubr.msk.f32.mxu1 %vm2511_vm0, %v2512_v8 }
0x111b   :  { %1021 = vrot.lane.b32.xlu0 %v1014_v44, %s2515_s5  ;;  %2372 = vmatprep.subr.bf16.mxu1 %v2510_v3  ;;  %v1015_v29 = vadd.f32 %v1014_v44, %v999_v28 }
0x111d   :  { %v1016_v30 = vmul.f32 0.5, %v1015_v29 }
0x111e   :  { %2374 = vmatpush3.bf16.msra.mxu1 %v2707_v45 }
0x111f   :  { %2381 = vmatprep.subr.bf16.mxu1 %v2510_v3  ;;  %2458 = vtanh.f32 %v1016_v30 }
0x1129   :  { %v2459_v31 = vpop.eup %2458 }
0x112a   :  { %v1018_v34 = vmul.f32 0.5, %v2459_v31 }
0x112c   :  { %v1019_v35 = vadd.f32 0.5, %v1018_v34 }
0x112e   :  { %v1031_v55 = vsub.f32 1.0, %v1019_v35  ;;  %v1037_v59 = vmul.f32 %v1019_v35, %v2838_v17 }
0x1166   :  { %v1558_v16 = vpop.f32.mrb[12].mxu0 }
0x1167   :  { %v2257_v27 = vpop.f32.mrb[13].mxu0  ;;  %v1559_v38 = vadd.f32 %v2636_v20, %v1558_v16 }
0x1169   :  { %v1562_v50 = vadd.f32 %v1559_v38, %v1486_v48 }
0x116b   :  { %v1563_v53 = vmul.f32 0.5, %v1562_v50 }
0x118d   :  { %v1022_v36 = vpop.permute.xlu0 %1021 }
0x118e   :  { %v1024_v37 = vmul.f32 %v1022_v36, %v1019_v35 }
0x1190   :  { %1026 = vrot.lane.b32.xlu0 %v1024_v37, %s2516_s26 }
0x1194   :  { %1568 = vrot.lane.b32.xlu0 %v1559_v38, %s2513_s0 }
0x11ec   :  { %v1218_v39 = vpop.f32.mrb[10].mxu1 }
0x11ed   :  { %v2224_v41 = vpop.f32.mrb[11].mxu1  ;;  %v1219_v14 = vadd.f32 %v2764_v4, %v1218_v39 }
0x1202   :  { %v1027_v42 = vpop.permute.xlu0 %1026 }
0x1203   :  { %v1029_v46 = vadd.f32 %v1027_v42, %v999_v28 }
0x1205   :  { %2460 = vtanh.f32 %v1029_v46 }
0x1206   :  { %2462 = vtanh.f32 %v1563_v53  ;;  %v1569_v58 = vpop.permute.xlu0 %1568 }
0x120f   :  { %v2461_v47 = vpop.eup %2460 }
0x1210   :  { %1033 = vrot.lane.b32.xlu1 %v2461_v47, %s2519_s6  ;;  %v2463_v54 = vpop.eup %2462 }
0x1211   :  { %v1565_v57 = vmul.f32 0.5, %v2463_v54 }
0x1213   :  { %v1566_v62 = vadd.f32 0.5, %v1565_v57 }
0x1215   :  { %v1571_v63 = vmul.f32 %v1569_v58, %v1566_v62  ;;  %v1578_v44 = vsub.f32 1.0, %v1566_v62  ;;  %v1584_v27 = vmul.f32 %v1566_v62, %v2832_v6 }
0x1282   :  { %v1034_v56 = vpop.permute.xlu1 %1033 }
0x1283   :  { %v1036_v60 = vmul.f32 %v1034_v56, %v1031_v55 }
0x1285   :  { %v2869_v61 = vadd.f32 %v1037_v59, %v1036_v60 }
0x1287   :  { %1230 = vperm.xlu0 %2418, %v2869_v61   ;;  %1224 = vperm.xlu1 %2417, %v2869_v61  }
0x128b   :  { %1573 = vrot.lane.b32.xlu1 %v1571_v63, %s2513_s0 }
0x1306   :  { %v1225_v0 = vpop.permute.xlu1 %1224  ;;  %v1231_v25 = vpop.permute.xlu0 %1230 }
0x1307   :  { %v1227_v1 = vmul.f32 %v2717_v49, %v1225_v0  ;;  %v1233_v5 = vmul.f32 %v2728_v52, %v1231_v25 }
0x1309   :  { %v1228_v2 = vadd.f32 %v2723_v51, %v1227_v1 }
0x130a   :  { %v1574_v7 = vpop.permute.xlu1 %1573 }
0x130b   :  { %v1234_v10 = vadd.f32 %v1233_v5, %v1228_v2  ;;  %v1576_v11 = vadd.f32 %v1574_v7, %v1486_v48 }
0x130d   :  { %2464 = vtanh.f32 %v1576_v11  ;;  %1241 = vrot.lane.b32.xlu1 %v1234_v10, %s2515_s5  ;;  %v1235_v15 = vadd.f32 %v1234_v10, %v1219_v14 }
0x130f   :  { %v1236_v18 = vmul.f32 0.5, %v1235_v15 }
0x1311   :  { %1368 = vrot.lane.b32.xlu1 %v1366_v12, %s2514_s3  ;;  %2466 = vtanh.f32 %v1236_v18 }
0x1317   :  { %v2465_v13 = vpop.eup %2464 }
0x1318   :  { %1580 = vrot.lane.b32.xlu0 %v2465_v13, %s2514_s3 }
0x131b   :  { %v2467_v9 = vpop.eup %2466 }
0x131c   :  { %v1238_v19 = vmul.f32 0.5, %v2467_v9 }
0x131e   :  { %v1239_v21 = vadd.f32 0.5, %v1238_v19 }
0x1320   :  { %v1251_v38 = vsub.f32 1.0, %v1239_v21  ;;  %v1257_v6 = vmul.f32 %v1239_v21, %v2869_v61 }
0x137f   :  { %v1242_v22 = vpop.permute.xlu1 %1241 }
0x1380   :  { %v1244_v24 = vmul.f32 %v1242_v22, %v1239_v21 }
0x1382   :  { %1246 = vrot.lane.b32.xlu0 %v1244_v24, %s2516_s26 }
0x1383   :  { %v1369_v26 = vpop.permute.xlu1 %1368 }
0x1384   :  { %2245 = vmatmul.mubr.msk.f32.vlgmr.msra.gmra.mrb[12].mxu1 %vm152_vm4, %v1369_v26 }
0x1385   :  { %2383 = vmatpush3.bf16.msra.mxu1 %v2697_v40  ;;  %2266 = vmatprep.mubr.msk.f32.mxu1 %vm2511_vm0, %v2512_v8 }
0x1386   :  { %2384 = vmatprep.subr.bf16.mxu1 %v2510_v3 }
0x1389   :  { %2386 = vmatpush3.bf16.msra.mxu1 %v2707_v45 }
0x138a   :  { %v1581_v16 = vpop.permute.xlu0 %1580  ;;  %2393 = vmatprep.subr.bf16.mxu1 %v2510_v3 }
0x138b   :  { %v1583_v28 = vmul.f32 %v1581_v16, %v1578_v44 }
0x138d   :  { %v2891_v29 = vadd.f32 %v1584_v27, %v1583_v28 }
0x138f   :  { %1708 = vrot.lane.b32.xlu1 %v2891_v29, %s2514_s3  ;;  %v1586_v46 = vmax.f32 %v2891_v29, 0.0 }
0x13f4   :  { %v1247_v30 = vpop.permute.xlu0 %1246 }
0x13f5   :  { %v1249_v31 = vadd.f32 %v1247_v30, %v1219_v14 }
0x13f7   :  { %2468 = vtanh.f32 %v1249_v31 }
0x1401   :  { %v2469_v34 = vpop.eup %2468  ;;  %v1709_v35 = vpop.permute.xlu1 %1708 }
0x1402   :  { %2278 = vmatmul.mubr.msk.f32.vlgmr.msra.gmra.mrb[14].mxu0 %vm152_vm4, %v1709_v35  ;;  %1253 = vrot.lane.b32.xlu0 %v2469_v34, %s2519_s6 }
0x1457   :  { %v1438_v36 = vpop.f32.mrb[12].mxu1 }
0x1458   :  { %v2246_v37 = vpop.f32.mrb[13].mxu1 }
0x1474   :  { %v1254_v39 = vpop.permute.xlu0 %1253 }
0x1475   :  { %v1256_v41 = vmul.f32 %v1254_v39, %v1251_v38 }
0x1477   :  { %v2898_v42 = vadd.f32 %v1257_v6, %v1256_v41 }
0x1479   :  { %1450 = vperm.xlu0 %2418, %v2898_v42   ;;  %1444 = vperm.xlu1 %2417, %v2898_v42  }
0x147d   :  { %1588 = vrot.lane.b32.xlu0 %v1586_v46, %s2514_s3 }
0x14d5   :  { %v1778_v47 = vpop.f32.mrb[14].mxu0 }
0x14d6   :  { %v1779_v48 = vadd.f32 %v2636_v20, %v1778_v47  ;;  %v2279_v50 = vpop.f32.mrb[15].mxu0  ;;  %v1706_v20 = vld [vmem:[#allocation2 + $0xe] sm:$0x3] }
0x14d8   :  { %1788 = vrot.lane.b32.xlu0 %v1779_v48, %s2513_s0  ;;  %v1782_v58 = vadd.f32 %v1779_v48, %v1706_v20 }
0x14da   :  { %v1783_v62 = vmul.f32 0.5, %v1782_v58 }
0x14dc   :  { %2470 = vtanh.f32 %v1783_v62 }
0x14e6   :  { %v2471_v63 = vpop.eup %2470 }
0x14e7   :  { %v1785_v0 = vmul.f32 0.5, %v2471_v63 }
0x14e9   :  { %v1786_v25 = vadd.f32 0.5, %v1785_v0 }
0x14eb   :  { %v1798_v35 = vsub.f32 1.0, %v1786_v25  ;;  %v1804_v37 = vmul.f32 %v1786_v25, %v2891_v29 }
0x14f8   :  { %v1451_v53 = vpop.permute.xlu0 %1450  ;;  %v1445_v54 = vpop.permute.xlu1 %1444 }
0x14f9   :  { %v1447_v55 = vmul.f32 %v2717_v49, %v1445_v54  ;;  %v1453_v56 = vmul.f32 %v2728_v52, %v1451_v53 }
0x14fb   :  { %v1448_v57 = vadd.f32 %v2723_v51, %v1447_v55 }
0x14fc   :  { %v1589_v59 = vpop.permute.xlu0 %1588 }
0x14fd   :  { %2267 = vmatmul.mubr.msk.f32.vlgmr.msra.gmra.mrb[14].mxu1 %vm152_vm4, %v1589_v59  ;;  %v1454_v60 = vadd.f32 %v1453_v56, %v1448_v57 }
0x14fe   :  { %2395 = vmatpush3.bf16.msra.mxu1 %v2697_v40  ;;  %2288 = vmatprep.mubr.msk.f32.mxu1 %vm2511_vm0, %v2512_v8  ;;  %v1439_v40 = vadd.f32 %v2764_v4, %v1438_v36 }
0x14ff   :  { %1461 = vrot.lane.b32.xlu1 %v1454_v60, %s2515_s5  ;;  %2396 = vmatprep.subr.bf16.mxu1 %v2510_v3 }
0x1500   :  { %v1455_v8 = vadd.f32 %v1454_v60, %v1439_v40 }
0x1502   :  { %2398 = vmatpush3.bf16.msra.mxu1 %v2707_v45  ;;  %v1456_v5 = vmul.f32 0.5, %v1455_v8 }
0x1504   :  { %2472 = vtanh.f32 %v1456_v5 }
0x150e   :  { %v2473_v7 = vpop.eup %2472 }
0x150f   :  { %v1458_v3 = vmul.f32 0.5, %v2473_v7 }
0x1511   :  { %v1459_v10 = vadd.f32 0.5, %v1458_v3  ;;  %v2947_v3 = vld [vmem:[%s2999_s7] ss:$0 sm:$0xff]  ;;  %s2521_s7 = smov 127  }
0x1513   :  { %v1471_v21 = vsub.f32 1.0, %v1459_v10  ;;  %v1477_v24 = vmul.f32 %v1459_v10, %v2898_v42 }
0x154a   :  { %v1789_v1 = vpop.permute.xlu0 %1788 }
0x154b   :  { %v1791_v2 = vmul.f32 %v1789_v1, %v1786_v25 }
0x154d   :  { %1793 = vrot.lane.b32.xlu0 %v1791_v2, %s2513_s0  ;;  %s2525_s0 = smov [#allocation3]  }
0x154e   :  { %s1976_s9 = sshll.u32 %s2525_s0, 4  ;;  %s1977_s9 = int_to_ptr.vmem [resolvable:$true] %s1976_s9 }
0x154f   :  { %s2486_s10 = scalar_lea.vmem %s1977_s9, 32  ;;  %p2491_p1 = scmp.lt.s32.totalorder %s1977_s9, %s1977_s9 }
0x1550   :  { %p2487_p0 = scmp.ne.s32.totalorder %s1977_s9, %s2486_s10  ;;  %p2492_p2 = scmp.lt.s32.totalorder %s2486_s10, %s2486_s10 }
0x1552   :  { %p2493_p3 = por %p2492_p2, %p2491_p1 }
0x1554   :  { %p2494_p4 = pnand %p2493_p3, %p2487_p0 }
0x1571   :  { %v1462_v45 = vpop.permute.xlu1 %1461 }
0x1572   :  { %v1464_v11 = vmul.f32 %v1462_v45, %v1459_v10 }
0x1574   :  { %1466 = vrot.lane.b32.xlu1 %v1464_v11, %s2516_s26 }
0x15bf   :  { %v1794_v9 = vpop.permute.xlu0 %1793 }
0x15c0   :  { %v1796_v19 = vadd.f32 %v1794_v9, %v1706_v20 }
0x15d0   :  { %v1658_v12 = vpop.f32.mrb[14].mxu1 }
0x15d1   :  { %v2268_v13 = vpop.f32.mrb[15].mxu1  ;;  %v1659_v41 = vadd.f32 %v2764_v4, %v1658_v12 }
0x15e6   :  { %v1467_v14 = vpop.permute.xlu1 %1466 }
0x15e7   :  { %v1469_v15 = vadd.f32 %v1467_v14, %v1439_v40 }
0x15e9   :  { %2474 = vtanh.f32 %v1469_v15 }
0x15ea   :  { %2476 = vtanh.f32 %v1796_v19 }
0x15f3   :  { %v2475_v18 = vpop.eup %2474 }
0x15f4   :  { %1473 = vrot.lane.b32.xlu1 %v2475_v18, %s2519_s6  ;;  %v2477_v16 = vpop.eup %2476 }
0x1666   :  { %v1474_v22 = vpop.permute.xlu1 %1473 }
0x1667   :  { %v1476_v26 = vmul.f32 %v1474_v22, %v1471_v21 }
0x1669   :  { %v2921_v44 = vadd.f32 %v1477_v24, %v1476_v26 }
0x166b   :  { %1670 = vperm.xlu0 %2418, %v2921_v44   ;;  %1664 = vperm.xlu1 %2417, %v2921_v44  }
0x166f   :  { %1800 = vrot.lane.b32.xlu1 %v2477_v16, %s2514_s3  ;;  %2419 = vset.pattern.permute.xlu0 %v2518_v33 }
0x1670   :  { %2420 = vset.pattern.permute.xlu1 %v2517_v32 }
0x16ea   :  { %v1671_v27 = vpop.permute.xlu0 %1670  ;;  %v1665_v28 = vpop.permute.xlu1 %1664 }
0x16eb   :  { %v1667_v30 = vmul.f32 %v2717_v49, %v1665_v28  ;;  %v1673_v31 = vmul.f32 %v2728_v52, %v1671_v27 }
0x16ed   :  { %v1668_v34 = vadd.f32 %v2723_v51, %v1667_v30 }
0x16ee   :  { %v1801_v36 = vpop.permute.xlu1 %1800 }
0x16ef   :  { %v1803_v38 = vmul.f32 %v1801_v36, %v1798_v35  ;;  %v1674_v39 = vadd.f32 %v1673_v31, %v1668_v34 }
0x16f1   :  { %v1805_v6 = vadd.f32 %v1804_v37, %v1803_v38  ;;  %1681 = vrot.lane.b32.xlu0 %v1674_v39, %s2515_s5  ;;  %v1675_v46 = vadd.f32 %v1674_v39, %v1659_v41 }
0x16f3   :  { %v1806_v33 = vmax.f32 %v1805_v6, 0.0  ;;  %v1676_v47 = vmul.f32 0.5, %v1675_v46 }
0x16f5   :  { %1808 = vrot.lane.b32.xlu1 %v1806_v33, %s2514_s3  ;;  %2478 = vtanh.f32 %v1676_v47 }
0x16ff   :  { %v2479_v48 = vpop.eup %2478 }
0x1700   :  { %v1678_v50 = vmul.f32 0.5, %v2479_v48 }
0x1702   :  { %v1679_v53 = vadd.f32 0.5, %v1678_v50 }
0x1704   :  { %v1691_v58 = vsub.f32 1.0, %v1679_v53  ;;  %v1697_v63 = vmul.f32 %v1679_v53, %v2921_v44 }
0x1763   :  { %v1682_v54 = vpop.permute.xlu0 %1681 }
0x1764   :  { %v1684_v55 = vmul.f32 %v1682_v54, %v1679_v53 }
0x1766   :  { %1686 = vrot.lane.b32.xlu0 %v1684_v55, %s2516_s26 }
0x1767   :  { %v1809_v29 = vpop.permute.xlu1 %1808 }
0x1768   :  { %2289 = vmatmul.mubr.msk.f32.vlgmr.msra.gmra.mrb[16].mxu1 %vm152_vm4, %v1809_v29 }
0x17d8   :  { %v1687_v56 = vpop.permute.xlu0 %1686 }
0x17d9   :  { %v1689_v57 = vadd.f32 %v1687_v56, %v1659_v41 }
0x17db   :  { %2480 = vtanh.f32 %v1689_v57 }
0x17e5   :  { %v2481_v59 = vpop.eup %2480 }
0x17e6   :  { %1693 = vrot.lane.b32.xlu1 %v2481_v59, %s2519_s6 }
0x183b   :  { %v1878_v60 = vpop.f32.mrb[16].mxu1 }
0x183c   :  { %v2290_v20 = vpop.f32.mrb[17].mxu1 }
0x1858   :  { %v1694_v62 = vpop.permute.xlu1 %1693 }
0x1859   :  { %v1696_v0 = vmul.f32 %v1694_v62, %v1691_v58 }
0x185b   :  { %v1698_v25 = vadd.f32 %v1697_v63, %v1696_v0 }
0x185d   :  { %1890 = vperm.xlu1 %2420, %v1698_v25   ;;  %1884 = vperm.xlu0 %2419, %v1698_v25  }
0x1861   :  { %2421 = vset.pattern.permute.xlu0 %v2517_v32  ;;  %v1879_v32 = vadd.f32 %v2764_v4, %v1878_v60 }
0x18dc   :  { %v1891_v1 = vpop.permute.xlu1 %1890  ;;  %v1885_v2 = vpop.permute.xlu0 %1884 }
0x18dd   :  { %v1887_v40 = vmul.f32 %v2717_v49, %v1885_v2  ;;  %v1893_v8 = vmul.f32 %v2728_v52, %v1891_v1 }
0x18df   :  { %v1888_v5 = vadd.f32 %v2723_v51, %v1887_v40 }
0x18e1   :  { %v1894_v7 = vadd.f32 %v1893_v8, %v1888_v5 }
0x18e3   :  { %1901 = vrot.lane.b32.xlu1 %v1894_v7, %s2515_s5  ;;  %v1895_v10 = vadd.f32 %v1894_v7, %v1879_v32 }
0x18e5   :  { %v1896_v49 = vmul.f32 0.5, %v1895_v10 }
0x18e7   :  { %375 = vrot.lane.b32.xlu1 %v2947_v3, %s2520_s28  ;;  %2482 = vtanh.f32 %v1896_v49 }
0x18f1   :  { %v2483_v52 = vpop.eup %2482 }
0x18f2   :  { %v1898_v45 = vmul.f32 0.5, %v2483_v52 }
0x18f4   :  { %v1899_v51 = vadd.f32 0.5, %v1898_v45 }
0x18f6   :  { %v1911_v24 = vsub.f32 1.0, %v1899_v51 }
0x1955   :  { %v1902_v11 = vpop.permute.xlu1 %1901 }
0x1956   :  { %v1904_v12 = vmul.f32 %v1902_v11, %v1899_v51 }
0x1958   :  { %1906 = vrot.lane.b32.xlu0 %v1904_v12, %s2516_s26 }
0x1959   :  { %v376_v13 = vpop.permute.xlu1 %375 }
0x195a   :  { %v378_v14 = vmul.f32 %v376_v13, %v2775_v43  ;;  %v1039_v15 = vmul.f32 %v2869_v61, %v376_v13  ;;  %v1479_v4 = vmul.f32 %v2921_v44, %v376_v13  ;;  %v599_v21 = vmul.f32 %v2808_v23, %v376_v13 }
0x195b   :  { %v1259_v43 = vmul.f32 %v2898_v42, %v376_v13  ;;  %v1699_v61 = vmul.f32 %v1698_v25, %v376_v13  ;;  %v819_v22 = vmul.f32 %v2838_v17, %v376_v13  ;;  %v1917_v44 = vmul.f32 %v1899_v51, %v1698_v25 }
0x195c   :  { %382 = vrot.lane.b32.xlu1 %v378_v14, %s2521_s7  ;;  %v600_v23 = vadd.f32 %v2947_v3, %v599_v21  ;;  %v380_v34 = vadd.f32 %v2947_v3, %v378_v14  ;;  %v1040_v39 = vadd.f32 %v2947_v3, %v1039_v15  ;;  %v1480_v48 = vadd.f32 %v2947_v3, %v1479_v4 }
0x195d   :  { %v1260_v17 = vadd.f32 %v2947_v3, %v1259_v43  ;;  %v1700_v6 = vadd.f32 %v2947_v3, %v1699_v61  ;;  %v820_v59 = vadd.f32 %v2947_v3, %v819_v22 }
0x1960   :  { %1042 = vrot.lane.b32.xlu1 %v1039_v15, %s2521_s7 }
0x1964   :  { %1482 = vrot.lane.b32.xlu1 %v1479_v4, %s2521_s7 }
0x19ca   :  { %v1907_v18 = vpop.permute.xlu0 %1906 }
0x19cb   :  { %v1909_v9 = vadd.f32 %v1907_v18, %v1879_v32 }
0x19cd   :  { %2484 = vtanh.f32 %v1909_v9 }
0x19ce   :  { %v383_v27 = vpop.permute.xlu1 %382 }
0x19cf   :  { %v385_v37 = vadd.f32 %v383_v27, %v380_v34 }
0x19d2   :  { %v1043_v35 = vpop.permute.xlu1 %1042 }
0x19d3   :  { %v1045_v41 = vadd.f32 %v1043_v35, %v1040_v39 }
0x19d6   :  { %v1483_v47 = vpop.permute.xlu1 %1482 }
0x19d7   :  { %v2485_v19 = vpop.eup %2484  ;;  %v1485_v50 = vadd.f32 %v1483_v47, %v1480_v48 }
0x19d8   :  { %1913 = vrot.lane.b32.xlu0 %v2485_v19, %s2519_s6 }
0x19dc   :  { %602 = vrot.lane.b32.xlu0 %v599_v21, %s2521_s7 }
0x19e0   :  { %1262 = vrot.lane.b32.xlu0 %v1259_v43, %s2521_s7 }
0x19e4   :  { %1702 = vrot.lane.b32.xlu0 %v1699_v61, %s2521_s7 }
0x19e8   :  { %822 = vrot.lane.b32.xlu0 %v819_v22, %s2521_s7 }
0x1a4a   :  { %v1914_v26 = vpop.permute.xlu0 %1913 }
0x1a4b   :  { %v1916_v16 = vmul.f32 %v1914_v26, %v1911_v24 }
0x1a4d   :  { %v1918_v28 = vadd.f32 %v1917_v44, %v1916_v16 }
0x1a4e   :  { %v603_v30 = vpop.permute.xlu0 %602 }
0x1a4f   :  { %v605_v31 = vadd.f32 %v603_v30, %v600_v23  ;;  %v1919_v42 = vmul.f32 %v1918_v28, %v376_v13 }
0x1a51   :  { %1922 = vrot.lane.b32.xlu1 %v1919_v42, %s2521_s7  ;;  %1931 = vrot.lane.b32.xlu0 %v605_v31, %s2521_s7  ;;  %v1920_v53 = vadd.f32 %v2947_v3, %v1919_v42 }
0x1a52   :  { %v1263_v36 = vpop.permute.xlu0 %1262 }
0x1a53   :  { %v1265_v38 = vadd.f32 %v1263_v36, %v1260_v17 }
0x1a55   :  { %1927 = vrot.lane.b32.xlu1 %v385_v37, %s2519_s6  ;;  %1939 = vrot.lane.b32.xlu0 %v1265_v38, %s2520_s28 }
0x1a56   :  { %v1703_v33 = vpop.permute.xlu0 %1702 }
0x1a57   :  { %v1705_v46 = vadd.f32 %v1703_v33, %v1700_v6 }
0x1a59   :  { %1935 = vrot.lane.b32.xlu1 %v1045_v41, %s2522_s29  ;;  %1947 = vrot.lane.b32.xlu0 %v1705_v46, %s2516_s26 }
0x1a5a   :  { %v823_v56 = vpop.permute.xlu0 %822 }
0x1a5b   :  { %v825_v58 = vadd.f32 %v823_v56, %v820_v59 }
0x1a5d   :  { %1943 = vrot.lane.b32.xlu1 %v1485_v50, %s2523_s1 }
0x1ac3   :  { %v1923_v54 = vpop.permute.xlu1 %1922  ;;  %v1932_v57 = vpop.permute.xlu0 %1931 }
0x1ac4   :  { %v1925_v55 = vadd.f32 %v1923_v54, %v1920_v53 }
0x1ac6   :  { %1951 = vrot.lane.b32.xlu1 %v1925_v55, %s2524_s30 }
0x1ac7   :  { %v1928_v29 = vpop.permute.xlu1 %1927  ;;  %v1940_v63 = vpop.permute.xlu0 %1939 }
0x1ac8   :  { %v1955_v20 = vsel %vm1954_vm5, %v1928_v29, %v1932_v57 }
0x1ac9   :  { %v1957_v62 = vsel %vm1956_vm6, %v1955_v20, %v825_v58 }
0x1acb   :  { %v1936_v60 = vpop.permute.xlu1 %1935  ;;  %v1948_v40 = vpop.permute.xlu0 %1947 }
0x1acc   :  { %v1959_v0 = vsel %vm1958_vm7, %v1957_v62, %v1936_v60 }
0x1acd   :  { %v1961_v1 = vsel %vm1960_vm8, %v1959_v0, %v1940_v63 }
0x1acf   :  { %v1944_v25 = vpop.permute.xlu1 %1943 }
0x1ad0   :  { %v1963_v2 = vsel %vm1962_vm9, %v1961_v1, %v1944_v25 }
0x1ad1   :  { %v1965_v5 = vsel %vm1964_vm10, %v1963_v2, %v1948_v40 }
0x1b38   :  { %v1952_v8 = vpop.permute.xlu1 %1951 }
0x1b39   :  { %v1967_v7 = vsel %vm1966_vm11, %v1965_v5, %v1952_v8 }
0x1b3a   :  { %1969 = vst.msk [vmem:[#allocation3] sm:$0x3] %vm1968_vm12, %v1967_v7 }
0x1b3b   :  { %2497 = shalt.err (!%p2494_p4)
}
0x1b3c   :  { %s2498_s12 = scalar_lea.hbm %s3000_s8, 32 }
0x1b3d   :  { %p2499_p5 = scmp.ne.s32.totalorder %s3000_s8, %s2498_s12  ;;  %p2502_p6 = scmp.lt.u32.totalorder %s2498_s12, %s3000_s8 }
0x1b3f   :  { %p2504_p7 = pnand %p2502_p6, %p2499_p5 }
0x1b41   :  { %2507 = shalt.err (!%p2504_p7)
}
0x1b42   :  { %1979 = dma.vmem_to_hbm [thread:$0]  %s1977_s9, 32, %s3000_s8, [#allocation4]  }
0x1b43   :  { %2508 = dma.done.wait [#allocation4], 32  }
0x1b44   :  { %2509 = vsyncadd [#allocation4], 4294967264 }
0x1b45   :  { %1983 = vsyncpa [#allocation4], 1 }

</bundles_post_ra>
